<compile_context>
chip_gen: v7x
topology: tpu7x:2x2x1
jax: 0.10.0
libtpu: 0.0.40
codegen_flags: <defaults>
</compile_context>

<pallas_src>
import functools

import jax
import jax.numpy as jnp
from jax.experimental import pallas as pl
from jax.experimental.pallas import tpu as pltpu


# ----------------------------------------------------------------------------
# Fused whole-network kernel (transposed / lane-dense orientation)
# ----------------------------------------------------------------------------
def _dict_exp_multi_kernel(x_ref, w_ref, b_ref, o_ref, *, layer_dims, latent_in):
    """Refs:
      x_ref : (1, D_in, TM)            input tile, points on lanes
      w_ref : (1, L, max_out, max_in)  per-batch fused weights U@diag(exp(S))@Vt
      b_ref : (L, max_out, 1)          biases (broadcast along lanes)
      o_ref : (1, d_out, TM)           output tile (lane-dense)
    """
    n = len(layer_dims)
    x0 = x_ref[0]                                # (D_in, TM) — also the skip input
    x = x0
    for i, (in_dim, out_dim) in enumerate(layer_dims):
        if i in latent_in:
            # concat([x, input]) along the feature (sublane) axis — cheap, aligned.
            xin = jnp.concatenate([x, x0], axis=0)        # (prev_out + D_in, TM)
        else:
            xin = x
        w = w_ref[0, i, :out_dim, :in_dim]                # (out, in) fused weight
        h = jnp.dot(w, xin.astype(w.dtype),
                    preferred_element_type=jnp.float32)   # (out, TM), f32 accum
        y = h + b_ref[i, :out_dim, :]                     # lane-broadcast bias
        if i < n - 1:
            y = jnp.maximum(y, 0.0)                       # ReLU (dropout p=0 -> id)
        x = y
    o_ref[0] = jnp.tanh(x).astype(o_ref.dtype)            # lane-dense tanh + store


# ----------------------------------------------------------------------------
# Wrapper: host-side weight fusion/stacking, tiling, single pallas_call
# ----------------------------------------------------------------------------
def dict_exp_multi_forward(params, inp, latent_in=(4,), tm=2048,
                           matmul_dtype=jnp.float32):
    B, P, D_in = inp.shape
    U, Sigma, Vt, bias = params["U"], params["Sigma"], params["Vt"], params["bias"]
    L = len(U)
    latent_in = tuple(int(i) for i in latent_in)
    assert all(0 < i < L for i in latent_in), latent_in   # latent layer must be > 0
    d_out = U[-1].shape[0]

    # --- per-layer dims + consistency checks -------------------------------
    layer_dims = []
    for i in range(L):
        r, in_dim = Vt[i].shape                  # torch Linear weight: (out=r, in)
        out_dim = U[i].shape[0]
        assert U[i].shape[1] == r
        if i == 0:
            assert in_dim == D_in, (in_dim, D_in)
        elif i in latent_in:
            assert in_dim == U[i - 1].shape[0] + D_in, (in_dim, U[i - 1].shape[0], D_in)
        else:
            assert in_dim == U[i - 1].shape[0], (in_dim, U[i - 1].shape[0])
        layer_dims.append((in_dim, out_dim))
    max_in = max(d[0] for d in layer_dims)
    max_out = max(d[1] for d in layer_dims)

    # --- fold exp(Sigma) into U@Vt per batch element; pad + stack ----------
    # W_i[b] = U_i @ diag(exp(Sigma_i[b])) @ Vt_i   -> (B, out, in)
    w_stack = jnp.zeros((B, L, max_out, max_in), dtype=jnp.float32)
    b_stack = jnp.zeros((L, max_out, 1), dtype=jnp.float32)
    for i, (in_dim, out_dim) in enumerate(layer_dims):
        sig = jnp.exp(Sigma[i])                                    # (B, r)
        fused = jnp.einsum("or,br,ri->boi", U[i], sig, Vt[i])      # (B, out, in)
        w_stack = w_stack.at[:, i, :out_dim, :in_dim].set(fused)
        b_stack = b_stack.at[i, :out_dim, 0].set(bias[i])
    w_stack = w_stack.astype(matmul_dtype)       # bf16 on v6e/v7x if requested

    # --- lane-dense input layout: (B, D_in, P) (points on lanes) -----------
    x_t = jnp.transpose(inp, (0, 2, 1))

    # --- point-tile selection (multiple of 128, or the full P) -------------
    tm = int(min(tm, P))
    if B == 1 and P >= 256:
        # v7x has 2 TensorCores: keep at least 2 grid steps when B == 1.
        tm = min(tm, -(-P // 2))
    if tm < P:
        tm = max(128, (tm // 128) * 128)
    grid = (B, pl.cdiv(P, tm))
    # Note: if P % tm != 0 the boundary tile computes tanh on padded lanes;
    # those lanes are discarded by the masked writeback (each point is
    # lane-independent), so results are correct.

    kernel = functools.partial(_dict_exp_multi_kernel,
                               layer_dims=tuple(layer_dims),
                               latent_in=latent_in)

    out_t = pl.pallas_call(
        kernel,
        out_shape=jax.ShapeDtypeStruct((B, d_out, P), inp.dtype),
        grid=grid,
        in_specs=[
            pl.BlockSpec((1, D_in, tm), lambda b, p: (b, 0, p)),          # input tile
            pl.BlockSpec((1, L, max_out, max_in), lambda b, p: (b, 0, 0, 0)),  # weights
            pl.BlockSpec((L, max_out, 1), lambda b, p: (0, 0, 0)),        # biases
        ],
        out_specs=pl.BlockSpec((1, d_out, tm), lambda b, p: (b, 0, p)),
        compiler_params=pltpu.CompilerParams(
            dimension_semantics=("parallel", "parallel")),
    )(x_t, w_stack, b_stack)

    return jnp.transpose(out_t, (0, 2, 1))       # back to (B, P, d_out)


# ----------------------------------------------------------------------------
# Pure-JAX reference mirroring the PyTorch forward (for verification)
# ----------------------------------------------------------------------------
def dict_exp_multi_ref(params, inp, latent_in=(4,)):
    x = inp
    L = len(params["U"])
    for i in range(L):
        sig = jnp.exp(params["Sigma"][i])                              # (B, r)
        if i in latent_in:
            x = jnp.concatenate([x, inp], axis=2)
        x = jnp.einsum("bpd,rd->bpr", x, params["Vt"][i])              # Vt (no bias)
        x = x * sig[:, None, :]
        x = jnp.einsum("bpr,or->bpo", x, params["U"][i]) + params["bias"][i][None, None, :]
        if i < L - 1:
            x = jnp.maximum(x, 0.0)
    return jnp.tanh(x)


# ----------------------------------------------------------------------------
# Deterministic parameter construction (shapes implied by Dict_exp_multi.__init__)
# ----------------------------------------------------------------------------
def make_params(key, *, batch, d_in, hidden, d_out, rank, num_layers, latent_in=(4,)):
    U, Sigma, Vt, bias = [], [], [], []
    for i in range(num_layers):
        in_dim = d_in if i == 0 else hidden
        if i in latent_in:
            in_dim += d_in                       # skip-concat of the network input
        out_dim = d_out if i == num_layers - 1 else hidden
        key, ku, ks, kv, kb = jax.random.split(key, 5)
        U.append(0.15 * jax.random.normal(ku, (out_dim, rank), dtype=jnp.float32))
        Sigma.append(0.1 * jax.random.normal(ks, (batch, rank), dtype=jnp.float32))
        Vt.append(0.15 * jax.random.normal(kv, (rank, in_dim), dtype=jnp.float32))
        bias.append(0.01 * jax.random.normal(kb, (out_dim,), dtype=jnp.float32))
    return {"U": U, "Sigma": Sigma, "Vt": Vt, "bias": bias}


if __name__ == "__main__":
    # TODO(synk): positional_enc=True path (NeRF embedder) not implemented; it is
    # disabled by default in the module signature.
    key = jax.random.PRNGKey(0)
    key, kin = jax.random.split(key)

    B, P, D_IN, HIDDEN, D_OUT, RANK, NUM_LAYERS = 2, 512, 32, 64, 1, 32, 8
    LATENT_IN = (4,)

    params = make_params(
        key, batch=B, d_in=D_IN, hidden=HIDDEN, d_out=D_OUT, rank=RANK,
        num_layers=NUM_LAYERS, latent_in=LATENT_IN,
    )
    inp = jax.random.normal(kin, (B, P, D_IN), dtype=jnp.float32)

    ref = jax.block_until_ready(dict_exp_multi_ref(params, inp, latent_in=LATENT_IN))

    # Default config: single point tile spanning P (grid = (B, 1)).
    out = jax.block_until_ready(dict_exp_multi_forward(params, inp, latent_in=LATENT_IN))
    assert out.shape == (B, P, D_OUT), out.shape
    err = float(jnp.max(jnp.abs(out - ref)))
    assert jnp.allclose(out, ref, atol=2e-4, rtol=2e-4), err

    # Multi-tile path (grid = (B, 4)) exercises the pipelined point axis.
    out2 = jax.block_until_ready(
        dict_exp_multi_forward(params, inp, latent_in=LATENT_IN, tm=128))
    assert jnp.allclose(out2, ref, atol=2e-4, rtol=2e-4)

    # bf16 MXU-input / f32-accumulate path (recommended on v6e/v7x).
    out3 = jax.block_until_ready(
        dict_exp_multi_forward(params, inp, latent_in=LATENT_IN,
                               matmul_dtype=jnp.bfloat16))
    assert jnp.allclose(out3, ref, atol=0.15), float(jnp.max(jnp.abs(out3 - ref)))

    print("KERNEL_OK")
</pallas_src>

<mosaic_0001>
module attributes {stable_mosaic.version = 11 : i64} {
  func.func @_dict_exp_multi_kernel(%arg0: i32, %arg1: i32, %arg2: memref<1x32x512xf32, #tpu.memory_space<vmem>>, %arg3: memref<1x8x64x96xf32, #tpu.memory_space<vmem>>, %arg4: memref<8x64x1xf32, #tpu.memory_space<vmem>>, %arg5: memref<1x1x512xf32, #tpu.memory_space<vmem>>) attributes {dimension_semantics = [#tpu.dimension_semantics<parallel>, #tpu.dimension_semantics<parallel>], iteration_bounds = array<i64: 2, 1>, scalar_prefetch = 0 : i64, scratch_operands = 0 : i64, tpu.core_type = #tpu.core_type<tc>, window_params = [{transform_indices = @transform_0, window_bounds = array<i64: 1, 32, 512>}, {transform_indices = @transform_1, window_bounds = array<i64: 1, 8, 64, 96>}, {pipeline_mode = #tpu.pipeline_mode<synchronous>, transform_indices = @transform_2, window_bounds = array<i64: 8, 64, 1>}, {transform_indices = @transform_3, window_bounds = array<i64: 1, 1, 512>}]} {
    %c0 = arith.constant 0 : index
    %c0_0 = arith.constant 0 : index
    %c0_1 = arith.constant 0 : index
    %0 = vector.load %arg2[%c0, %c0_0, %c0_1] : memref<1x32x512xf32, #tpu.memory_space<vmem>>, vector<1x32x512xf32>
    %1 = vector.shape_cast %0 : vector<1x32x512xf32> to vector<32x512xf32>
    %c0_2 = arith.constant 0 : index
    %c0_3 = arith.constant 0 : index
    %c0_4 = arith.constant 0 : index
    %c0_5 = arith.constant 0 : index
    %2 = vector.load %arg3[%c0_2, %c0_3, %c0_4, %c0_5] : memref<1x8x64x96xf32, #tpu.memory_space<vmem>>, vector<1x1x64x32xf32>
    %3 = vector.shape_cast %2 : vector<1x1x64x32xf32> to vector<64x32xf32>
    %cst = arith.constant dense<0.000000e+00> : vector<64x512xf32>
    %4 = tpu.matmul %3, %1, %cst {dimension_numbers = #tpu.dot_dimension_numbers<[1], [0], [0], [1], [0, 0, 1, 1], [], []>} : vector<64x32xf32>, vector<32x512xf32>, vector<64x512xf32> -> vector<64x512xf32>
    %c0_6 = arith.constant 0 : index
    %c0_7 = arith.constant 0 : index
    %c0_8 = arith.constant 0 : index
    %5 = vector.load %arg4[%c0_6, %c0_7, %c0_8] : memref<8x64x1xf32, #tpu.memory_space<vmem>>, vector<1x64x1xf32>
    %6 = vector.shape_cast %5 : vector<1x64x1xf32> to vector<64x1xf32>
    %7 = vector.broadcast %6 : vector<64x1xf32> to vector<64x512xf32>
    %8 = arith.addf %4, %7 : vector<64x512xf32>
    %cst_9 = arith.constant 0.000000e+00 : f32
    %9 = vector.broadcast %cst_9 : f32 to vector<64x512xf32>
    %10 = arith.maximumf %8, %9 : vector<64x512xf32>
    %c0_10 = arith.constant 0 : index
    %c1 = arith.constant 1 : index
    %c0_11 = arith.constant 0 : index
    %c0_12 = arith.constant 0 : index
    %11 = vector.load %arg3[%c0_10, %c1, %c0_11, %c0_12] : memref<1x8x64x96xf32, #tpu.memory_space<vmem>>, vector<1x1x64x64xf32>
    %12 = vector.shape_cast %11 : vector<1x1x64x64xf32> to vector<64x64xf32>
    %cst_13 = arith.constant dense<0.000000e+00> : vector<64x512xf32>
    %13 = tpu.matmul %12, %10, %cst_13 {dimension_numbers = #tpu.dot_dimension_numbers<[1], [0], [0], [1], [0, 0, 1, 1], [], []>} : vector<64x64xf32>, vector<64x512xf32>, vector<64x512xf32> -> vector<64x512xf32>
    %c1_14 = arith.constant 1 : index
    %c0_15 = arith.constant 0 : index
    %c0_16 = arith.constant 0 : index
    %14 = vector.load %arg4[%c1_14, %c0_15, %c0_16] : memref<8x64x1xf32, #tpu.memory_space<vmem>>, vector<1x64x1xf32>
    %15 = vector.shape_cast %14 : vector<1x64x1xf32> to vector<64x1xf32>
    %16 = vector.broadcast %15 : vector<64x1xf32> to vector<64x512xf32>
    %17 = arith.addf %13, %16 : vector<64x512xf32>
    %cst_17 = arith.constant 0.000000e+00 : f32
    %18 = vector.broadcast %cst_17 : f32 to vector<64x512xf32>
    %19 = arith.maximumf %17, %18 : vector<64x512xf32>
    %c0_18 = arith.constant 0 : index
    %c2 = arith.constant 2 : index
    %c0_19 = arith.constant 0 : index
    %c0_20 = arith.constant 0 : index
    %20 = vector.load %arg3[%c0_18, %c2, %c0_19, %c0_20] : memref<1x8x64x96xf32, #tpu.memory_space<vmem>>, vector<1x1x64x64xf32>
    %21 = vector.shape_cast %20 : vector<1x1x64x64xf32> to vector<64x64xf32>
    %cst_21 = arith.constant dense<0.000000e+00> : vector<64x512xf32>
    %22 = tpu.matmul %21, %19, %cst_21 {dimension_numbers = #tpu.dot_dimension_numbers<[1], [0], [0], [1], [0, 0, 1, 1], [], []>} : vector<64x64xf32>, vector<64x512xf32>, vector<64x512xf32> -> vector<64x512xf32>
    %c2_22 = arith.constant 2 : index
    %c0_23 = arith.constant 0 : index
    %c0_24 = arith.constant 0 : index
    %23 = vector.load %arg4[%c2_22, %c0_23, %c0_24] : memref<8x64x1xf32, #tpu.memory_space<vmem>>, vector<1x64x1xf32>
    %24 = vector.shape_cast %23 : vector<1x64x1xf32> to vector<64x1xf32>
    %25 = vector.broadcast %24 : vector<64x1xf32> to vector<64x512xf32>
    %26 = arith.addf %22, %25 : vector<64x512xf32>
    %cst_25 = arith.constant 0.000000e+00 : f32
    %27 = vector.broadcast %cst_25 : f32 to vector<64x512xf32>
    %28 = arith.maximumf %26, %27 : vector<64x512xf32>
    %c0_26 = arith.constant 0 : index
    %c3 = arith.constant 3 : index
    %c0_27 = arith.constant 0 : index
    %c0_28 = arith.constant 0 : index
    %29 = vector.load %arg3[%c0_26, %c3, %c0_27, %c0_28] : memref<1x8x64x96xf32, #tpu.memory_space<vmem>>, vector<1x1x64x64xf32>
    %30 = vector.shape_cast %29 : vector<1x1x64x64xf32> to vector<64x64xf32>
    %cst_29 = arith.constant dense<0.000000e+00> : vector<64x512xf32>
    %31 = tpu.matmul %30, %28, %cst_29 {dimension_numbers = #tpu.dot_dimension_numbers<[1], [0], [0], [1], [0, 0, 1, 1], [], []>} : vector<64x64xf32>, vector<64x512xf32>, vector<64x512xf32> -> vector<64x512xf32>
    %c3_30 = arith.constant 3 : index
    %c0_31 = arith.constant 0 : index
    %c0_32 = arith.constant 0 : index
    %32 = vector.load %arg4[%c3_30, %c0_31, %c0_32] : memref<8x64x1xf32, #tpu.memory_space<vmem>>, vector<1x64x1xf32>
    %33 = vector.shape_cast %32 : vector<1x64x1xf32> to vector<64x1xf32>
    %34 = vector.broadcast %33 : vector<64x1xf32> to vector<64x512xf32>
    %35 = arith.addf %31, %34 : vector<64x512xf32>
    %cst_33 = arith.constant 0.000000e+00 : f32
    %36 = vector.broadcast %cst_33 : f32 to vector<64x512xf32>
    %37 = arith.maximumf %35, %36 : vector<64x512xf32>
    %38 = tpu.concatenate %37, %1 in 0 : vector<64x512xf32>, vector<32x512xf32> -> vector<96x512xf32>
    %c0_34 = arith.constant 0 : index
    %c4 = arith.constant 4 : index
    %c0_35 = arith.constant 0 : index
    %c0_36 = arith.constant 0 : index
    %39 = vector.load %arg3[%c0_34, %c4, %c0_35, %c0_36] : memref<1x8x64x96xf32, #tpu.memory_space<vmem>>, vector<1x1x64x96xf32>
    %40 = vector.shape_cast %39 : vector<1x1x64x96xf32> to vector<64x96xf32>
    %cst_37 = arith.constant dense<0.000000e+00> : vector<64x512xf32>
    %41 = tpu.matmul %40, %38, %cst_37 {dimension_numbers = #tpu.dot_dimension_numbers<[1], [0], [0], [1], [0, 0, 1, 1], [], []>} : vector<64x96xf32>, vector<96x512xf32>, vector<64x512xf32> -> vector<64x512xf32>
    %c4_38 = arith.constant 4 : index
    %c0_39 = arith.constant 0 : index
    %c0_40 = arith.constant 0 : index
    %42 = vector.load %arg4[%c4_38, %c0_39, %c0_40] : memref<8x64x1xf32, #tpu.memory_space<vmem>>, vector<1x64x1xf32>
    %43 = vector.shape_cast %42 : vector<1x64x1xf32> to vector<64x1xf32>
    %44 = vector.broadcast %43 : vector<64x1xf32> to vector<64x512xf32>
    %45 = arith.addf %41, %44 : vector<64x512xf32>
    %cst_41 = arith.constant 0.000000e+00 : f32
    %46 = vector.broadcast %cst_41 : f32 to vector<64x512xf32>
    %47 = arith.maximumf %45, %46 : vector<64x512xf32>
    %c0_42 = arith.constant 0 : index
    %c5 = arith.constant 5 : index
    %c0_43 = arith.constant 0 : index
    %c0_44 = arith.constant 0 : index
    %48 = vector.load %arg3[%c0_42, %c5, %c0_43, %c0_44] : memref<1x8x64x96xf32, #tpu.memory_space<vmem>>, vector<1x1x64x64xf32>
    %49 = vector.shape_cast %48 : vector<1x1x64x64xf32> to vector<64x64xf32>
    %cst_45 = arith.constant dense<0.000000e+00> : vector<64x512xf32>
    %50 = tpu.matmul %49, %47, %cst_45 {dimension_numbers = #tpu.dot_dimension_numbers<[1], [0], [0], [1], [0, 0, 1, 1], [], []>} : vector<64x64xf32>, vector<64x512xf32>, vector<64x512xf32> -> vector<64x512xf32>
    %c5_46 = arith.constant 5 : index
    %c0_47 = arith.constant 0 : index
    %c0_48 = arith.constant 0 : index
    %51 = vector.load %arg4[%c5_46, %c0_47, %c0_48] : memref<8x64x1xf32, #tpu.memory_space<vmem>>, vector<1x64x1xf32>
    %52 = vector.shape_cast %51 : vector<1x64x1xf32> to vector<64x1xf32>
    %53 = vector.broadcast %52 : vector<64x1xf32> to vector<64x512xf32>
    %54 = arith.addf %50, %53 : vector<64x512xf32>
    %cst_49 = arith.constant 0.000000e+00 : f32
    %55 = vector.broadcast %cst_49 : f32 to vector<64x512xf32>
    %56 = arith.maximumf %54, %55 : vector<64x512xf32>
    %c0_50 = arith.constant 0 : index
    %c6 = arith.constant 6 : index
    %c0_51 = arith.constant 0 : index
    %c0_52 = arith.constant 0 : index
    %57 = vector.load %arg3[%c0_50, %c6, %c0_51, %c0_52] : memref<1x8x64x96xf32, #tpu.memory_space<vmem>>, vector<1x1x64x64xf32>
    %58 = vector.shape_cast %57 : vector<1x1x64x64xf32> to vector<64x64xf32>
    %cst_53 = arith.constant dense<0.000000e+00> : vector<64x512xf32>
    %59 = tpu.matmul %58, %56, %cst_53 {dimension_numbers = #tpu.dot_dimension_numbers<[1], [0], [0], [1], [0, 0, 1, 1], [], []>} : vector<64x64xf32>, vector<64x512xf32>, vector<64x512xf32> -> vector<64x512xf32>
    %c6_54 = arith.constant 6 : index
    %c0_55 = arith.constant 0 : index
    %c0_56 = arith.constant 0 : index
    %60 = vector.load %arg4[%c6_54, %c0_55, %c0_56] : memref<8x64x1xf32, #tpu.memory_space<vmem>>, vector<1x64x1xf32>
    %61 = vector.shape_cast %60 : vector<1x64x1xf32> to vector<64x1xf32>
    %62 = vector.broadcast %61 : vector<64x1xf32> to vector<64x512xf32>
    %63 = arith.addf %59, %62 : vector<64x512xf32>
    %cst_57 = arith.constant 0.000000e+00 : f32
    %64 = vector.broadcast %cst_57 : f32 to vector<64x512xf32>
    %65 = arith.maximumf %63, %64 : vector<64x512xf32>
    %c0_58 = arith.constant 0 : index
    %c7 = arith.constant 7 : index
    %c0_59 = arith.constant 0 : index
    %c0_60 = arith.constant 0 : index
    %66 = vector.load %arg3[%c0_58, %c7, %c0_59, %c0_60] : memref<1x8x64x96xf32, #tpu.memory_space<vmem>>, vector<1x1x1x64xf32>
    %67 = vector.shape_cast %66 : vector<1x1x1x64xf32> to vector<1x64xf32>
    %cst_61 = arith.constant dense<0.000000e+00> : vector<1x512xf32>
    %68 = tpu.matmul %67, %65, %cst_61 {dimension_numbers = #tpu.dot_dimension_numbers<[1], [0], [0], [1], [0, 0, 1, 1], [], []>} : vector<1x64xf32>, vector<64x512xf32>, vector<1x512xf32> -> vector<1x512xf32>
    %c7_62 = arith.constant 7 : index
    %c0_63 = arith.constant 0 : index
    %c0_64 = arith.constant 0 : index
    %69 = vector.load %arg4[%c7_62, %c0_63, %c0_64] : memref<8x64x1xf32, #tpu.memory_space<vmem>>, vector<1x1x1xf32>
    %70 = vector.shape_cast %69 : vector<1x1x1xf32> to vector<1x1xf32>
    %71 = vector.broadcast %70 : vector<1x1xf32> to vector<1x512xf32>
    %72 = arith.addf %68, %71 : vector<1x512xf32>
    %73 = math.tanh %72 : vector<1x512xf32>
    %c0_65 = arith.constant 0 : index
    %c0_66 = arith.constant 0 : index
    %c0_67 = arith.constant 0 : index
    %74 = vector.load %arg5[%c0_65, %c0_66, %c0_67] : memref<1x1x512xf32, #tpu.memory_space<vmem>>, vector<1x1x512xf32>
    %75 = vector.shape_cast %74 : vector<1x1x512xf32> to vector<1x512xf32>
    %76 = vector.shape_cast %73 : vector<1x512xf32> to vector<1x1x512xf32>
    tpu.vector_store %arg5[%c0_65, %c0_66, %c0_67], %76 {strides = array<i32>} : memref<1x1x512xf32, #tpu.memory_space<vmem>>, vector<1x1x512xf32>,
    return
  }
  func.func @transform_0(%arg0: i32, %arg1: i32) -> (i32, i32, i32) {
    %c0_i32 = arith.constant 0 : i32
    %c0_i32_0 = arith.constant 0 : i32
    return %arg0, %c0_i32, %arg1 : i32, i32, i32
  }
  func.func @transform_1(%arg0: i32, %arg1: i32) -> (i32, i32, i32, i32) {
    %c0_i32 = arith.constant 0 : i32
    %c0_i32_0 = arith.constant 0 : i32
    %c0_i32_1 = arith.constant 0 : i32
    %c0_i32_2 = arith.constant 0 : i32
    return %arg0, %c0_i32, %c0_i32_0, %c0_i32_1 : i32, i32, i32, i32
  }
  func.func @transform_2(%arg0: i32, %arg1: i32) -> (i32, i32, i32) {
    %c0_i32 = arith.constant 0 : i32
    %c0_i32_0 = arith.constant 0 : i32
    %c0_i32_1 = arith.constant 0 : i32
    %c0_i32_2 = arith.constant 0 : i32
    return %c0_i32, %c0_i32_0, %c0_i32_1 : i32, i32, i32
  }
  func.func @transform_3(%arg0: i32, %arg1: i32) -> (i32, i32, i32) {
    %c0_i32 = arith.constant 0 : i32
    %c0_i32_0 = arith.constant 0 : i32
    return %arg0, %c0_i32, %arg1 : i32, i32, i32
  }
}

</mosaic_0001>

<bundles_post_ra>
// kernel: tpu_custom_call.1
= control target key start
LH: loop header
LB: loop body
LE: loop exit
PB: predicated region body
PF: predicated region fallthrough
CT: control target
= control target key end

     0   :  { %8 = vsyncpa [#allocation3], 0  ;;  %s4338_s0 = inlined_call_operand.vmem [shape: f32[2,32,512], index: 0, kind: input, shape index: {}]   ;;  %s4339_s1 = inlined_call_operand.hbm [shape: f32[2,8,64,96], index: 1, kind: input, shape index: {}]   ;;  %s4340_s2 = inlined_call_operand.vmem [shape: f32[8,64,1], index: 2, kind: input, shape index: {}]   ;;  %s4341_s3 = inlined_call_operand.hbm [shape: f32[2,1,512], index: 3, kind: output, shape index: {}]  }
   0x1   :  { %10 = vsyncpa [#allocation3 + $0x1], 0 }
   0x2   :  { %11 = vsyncpa [#allocation4], 0 }
   0x3   :  { %13 = vsyncpa [#allocation4 + $0x1], 0  ;;  %s3651_s12 = smov 0   ;;  %s3653_s13 = smov 0  }
   0x4   :  { %s3655_s14 = smov 0   ;;  %s3657_s15 = smov 0  }
   0x5   :  { %s3659_s16 = smov 0   ;;  %s3661_s17 = smov 0  }
   0x6 LB: > { %s2945_s18 = sadd.s32 4294967295, %s3622_s17   ;;  %s2946_s19 = sadd.s32 4294967294, %s3622_s17   ;;  %s3622_s17 = sphi %s3661_s17, %s19_s17   ;;  %s3618_s16 = sphi %s3659_s16, %s4356_s16   ;;  %s3614_s15 = sphi %s3657_s15, %s4355_s15   ;;  %s3610_s14 = sphi %s3655_s14, %s4354_s14   ;;  %s3606_s13 = sphi %s3653_s13, %s4353_s13   ;;  %s3602_s12 = sphi %s3651_s12, %s4352_s12  }
   0x7   : > { %s31_s20 = sadd.s32 1, %s3618_s16  ;;  %s66_s21 = sadd.s32 1, %s3610_s14 }
   0x8   : > { %p33_p0 = scmp.ge.s32.totalorder %s31_s20, 2  ;;  %p73_p1 = scmp.ne.s32.totalorder %s3610_s14, %s3606_s13 }
   0x9   : > { %p74_p2 = scmp.eq.s32.totalorder %s3622_s17, 0  ;;  %p79_p3 = scmp.ne.s32.totalorder %s3606_s13, %s3602_s12 }
   0xa   : > { %s4358_s20 = smov (%p33_p0, %s31_s20), 0  ;;  %p80_p5 = scmp.eq.s32.totalorder %s2945_s18, 0 }
   0xb   : > { %p3692_p4 = por %p74_p2, %p73_p1  ;;  %s63_s23 = ssub.s32 %s3618_s16, %s4358_s20 }
   0xc   : > { %p126_p6 = scmp.eq.s32.totalorder %s2945_s18, 1  ;;  %p64_p7 = scmp.eq.s32.totalorder %s63_s23, 0 }
   0xd   : > { %p3698_p8 = por %p80_p5, %p79_p3  ;;  %p132_p10 = scmp.eq.s32.totalorder %s2946_s19, 1 }
   0xe   : > { %p3702_p9 = por %p126_p6, %p73_p1  ;;  %p3445_p13 = scmp.lt.s32.totalorder %s3622_s17, 2 }
   0xf   : > { %s3707_s26 = scalar_select %p64_p7, %s3610_s14, %s66_s21  }
  0x10   : > { %s4345_s25 = scalar_select %p3702_p9, 1, 0 }
  0x11   : > { %p3709_p11 = por %p132_p10, %p79_p3  ;;  %s168_s28 = sand.u32 1, %s3610_s14  }
  0x12   : > { %s2949_s29 = sshll.u32 %s168_s28, 9  ;;  %s3174_s30 = sshll.u32 %s3618_s16, 13 }
  0x13   : > { %s4346_s27 = scalar_select %p3709_p11, 1, 0 }
  0x14   : > { %s3720_s6 = scalar_lea.hbm %s4339_s1, %s3174_s30  ;;  %s172_s7 = scalar_lea.vmem [#allocation2], %s2949_s29 }
  0x15   : > { %s179_s8 = sshll.u32 %s172_s7, 4  ;;  %p3726_p0 = pnand %p3445_p13, %p3692_p4  ;;  %s3722_s8 = int_to_ptr.vmem [resolvable:$true] %s179_s8 }
  0x16   : > { %s3731_s10 = scalar_lea.sflag [#allocation3], %s168_s28  ;;  %s3510_s11 = scalar_lea.hbm %s3720_s6, 8192 }
  0x17   : > { %p3511_p2 = scmp.ne.s32.totalorder %s3720_s6, %s3510_s11  ;;  %p3512_p3 = pneg %p3726_p0 }
  0x18   : > { %s3515_s21 = scalar_lea.hbm %s4339_s1, 16384  ;;  %p3516_p4 = scmp.lt.u32.totalorder %s3720_s6, %s4339_s1 }
  0x19   : > { %p3513_p5 = pnand %p3512_p3, %p3511_p2  ;;  %p3517_p7 = scmp.lt.u32.totalorder %s3515_s21, %s3510_s11 }
  0x1a   : > { %p3519_p13 = scmp.lt.u32.totalorder %s3510_s11, %s3720_s6 }
  0x1b   : > { %p3514_p6 = pneg %p3513_p5  ;;  %p3518_p10 = por %p3517_p7, %p3516_p4 }
  0x1d   : > { %p3520_p12 = por %p3519_p13, %p3518_p10 }
  0x1f   : > { %p3521_p1 = pnand %p3520_p12, %p3514_p6 }
  0x21   : > { %3524 = shalt.err (!%p3521_p1)
}
  0x22   : > { %s3525_s28 = scalar_lea.vmem %s3722_s8, 8192  ;;  %s3624_s29 = smov [#allocation2]  }
  0x23   : > { %p3526_p2 = scmp.ne.s32.totalorder %s3722_s8, %s3525_s28  ;;  %s3530_s30 = sshll.u32 %s3624_s29, 4  ;;  %s3531_s30 = int_to_ptr.vmem [resolvable:$false] %s3530_s30 }
  0x24   : > { %s3532_s4 = scalar_lea.vmem %s3531_s30, 16384  ;;  %p3533_p9 = scmp.lt.s32.totalorder %s3722_s8, %s3531_s30 }
  0x25   : > { %p3528_p5 = pnand %p3526_p2, %p3512_p3  ;;  %p3534_p4 = scmp.lt.s32.totalorder %s3532_s4, %s3525_s28 }
  0x27   : > { %p3529_p11 = pneg %p3528_p5  ;;  %p3535_p7 = por %p3534_p4, %p3533_p9 }
  0x29   : > { %p3536_p10 = pnand %p3535_p7, %p3529_p11 }
  0x2b   : > { %3539 = shalt.err (!%p3536_p10)
}
  0x2c   : > { %s3625_s5 = smov 128   ;;  %s3626_s7 = smov 8  }
  0x2d   : > { %3440 = dma.hbm_to_vmem [thread:$0]  (!%p3726_p0), %s3720_s6, 8192, %s3722_s8, %s3731_s10, %s3625_s5, %s3625_s5, %s3626_s7  }
  0x2e   : > { %p187_p12 = scmp.lt.s32.totalorder %s3622_s17, 3  ;;  %p4348_p1 = scmp.ge.s32.totalorder %s3622_s17, 1 }
  0x30   : > { %p188_p3 = pnand %p4348_p1, %p187_p12 }
  0x31   : > { %s3763_s11 = sand.u32 (!%p188_p3), 1, %s3606_s13  }
  0x32   : > { %191 = sbr.rel (%p188_p3) target bundleno = 2091 (0x82b), region = 32  ;;  %s2953_s18 = sshll.u32 (!%p188_p3), %s3763_s11, 9 }
  0x33   : > { %s194_s19 = scalar_lea.sflag (!%p188_p3), [#allocation3], %s3763_s11  ;;  %s3767_s21 = scalar_lea.vmem (!%p188_p3), [#allocation2], %s2953_s18 }
  0x39   : > { %3593 = dma.done.wait (%p3698_p8), %s194_s19, 8192  }
  0x3a   : > { %3595 = vsyncadd (%p3698_p8), %s194_s19, 4294959104  ;;  %p230_p9 = scmp.lt.s32.totalorder %s3614_s15, 1  ;;  %v3627_v0 = vmov 0   ;;  %v3628_v1 = vmov 0.0   ;;  %v266_v2 = vld [vmem:[%s4340_s2 + $0x10] sm:$0xff]  ;;  %v264_v3 = vld [vmem:[%s4340_s2] sm:$0xff] }
  0x3b   : > { %3501 = vset.pattern.permute.xlu1 %v3627_v0  ;;  %3500 = vset.pattern.permute.xlu0 %v3627_v0  ;;  %v267_v15 = vld [vmem:[%s4340_s2 + $0x18] sm:$0xff]  ;;  %v265_v16 = vld [vmem:[%s4340_s2 + $0x8] sm:$0xff]  ;;  %v268_v31 = vld [vmem:[%s4340_s2 + $0x20] sm:$0xff]  ;;  %vm312_vm0 = vcmask 261120   ;;  %vm653_vm1 = vcmask 523264   ;;  %vm1674_vm2 = vcmask 785408  }
  0x3c   : > { %s231_s6 = scalar_select %p230_p9, %s3614_s15, 1  ;;  %401 = vmatprep.mubr.f32.mxu0 %v3628_v1  ;;  %514 = vmatprep.mubr.f32.mxu1 %v3628_v1  ;;  %v269_v29 = vld [vmem:[%s4340_s2 + $0x28] sm:$0xff]  ;;  %v256_v32 = vld [vmem:[%s3767_s21] sm:$0xff]  ;;  %v271_v33 = vld [vmem:[%s4340_s2 + $0x38] sm:$0xff] }
  0x3d   : > { %284 = vperm.xlu1 %3501, %v266_v2   ;;  %274 = vperm.xlu0 %3500, %v264_v3   ;;  %v270_v34 = vld [vmem:[%s4340_s2 + $0x30] sm:$0xff]  ;;  %v257_v35 = vld [vmem:[%s3767_s21 + $0x8] sm:$0xff]  ;;  %v2981_v37 = vld [vmem:[%s4340_s2 + $0x40] sm:$0xff]  ;;  %s3176_s19 = sshll.u32 %s3614_s15, 6  ;;  %s2830_s24 = scalar_lea.sflag [#allocation4], %s3763_s11 }
  0x3e   : > { %s3175_s8 = sshll.u32 %s231_s6, 7  ;;  %v2982_v36 = vld [vmem:[%s4340_s2 + $0x48] sm:$0xff]  ;;  %v258_v38 = vld [vmem:[%s3767_s21 + $0x10] sm:$0xff]  ;;  %v2984_v39 = vld [vmem:[%s4340_s2 + $0x58] sm:$0xff]  ;;  %p4349_p11 = scmp.ne.s32.totalorder %s4345_s25, 0 }
  0x3f   : > { %s3780_s22 = scalar_lea.vmem %s4338_s0, %s3175_s8  ;;  %v2983_v40 = vld [vmem:[%s4340_s2 + $0x50] sm:$0xff]  ;;  %v259_v41 = vld [vmem:[%s3767_s21 + $0x18] sm:$0xff]  ;;  %v2986_v42 = vld [vmem:[%s4340_s2 + $0x68] sm:$0xff]  ;;  %s3630_s15 = smov [#allocation5]  }
  0x40   : > { %v241_v4 = vld [vmem:[%s3780_s22 + $0x8] sm:$0xff]  ;;  %v243_v6 = vld [vmem:[%s3780_s22 + $0x18] sm:$0xff]  ;;  %v240_v10 = vld [vmem:[%s3780_s22] sm:$0xff]  ;;  %s3544_s28 = sshll.u32 %s3630_s15, 4  ;;  %s3545_s28 = int_to_ptr.vmem [resolvable:$false] %s3544_s28 }
  0x41   : > { %v245_v5 = vld [vmem:[%s3780_s22 + $0x28] sm:$0xff]  ;;  %v247_v7 = vld [vmem:[%s3780_s22 + $0x38] sm:$0xff]  ;;  %v244_v11 = vld [vmem:[%s3780_s22 + $0x20] sm:$0xff]  ;;  %289 = vperm.xlu1 %3501, %v267_v15   ;;  %279 = vperm.xlu0 %3500, %v265_v16   ;;  %s3546_s29 = scalar_lea.vmem %s3545_s28, 128 }
  0x42   : > { %v3792_v8 = vpack.c.bf16 %v245_v5, %v241_v4  ;;  %v3794_v9 = vpack.c.bf16 %v247_v7, %v243_v6  ;;  %v242_v12 = vld [vmem:[%s3780_s22 + $0x10] sm:$0xff]  ;;  %v3799_v13 = vpack.c.bf16 %v244_v11, %v240_v10  ;;  %v249_v18 = vld [vmem:[%s3780_s22 + $0x48] sm:$0xff]  ;;  %v251_v20 = vld [vmem:[%s3780_s22 + $0x58] sm:$0xff] }
  0x43   : > { %v246_v14 = vld [vmem:[%s3780_s22 + $0x30] sm:$0xff]  ;;  %v253_v19 = vld [vmem:[%s3780_s22 + $0x68] sm:$0xff]  ;;  %v255_v22 = vld [vmem:[%s3780_s22 + $0x78] sm:$0xff] }
  0x44   : > { %3178 = vmatprep.subr.bf16.mxu0 %v3792_v8  ;;  %3186 = vmatprep.subr.bf16.mxu1 %v3794_v9  ;;  %v3810_v17 = vpack.c.bf16 %v246_v14, %v242_v12  ;;  %v3816_v21 = vpack.c.bf16 %v253_v19, %v249_v18  ;;  %v248_v23 = vld [vmem:[%s3780_s22 + $0x40] sm:$0xff]  ;;  %v3822_v25 = vpack.c.bf16 %v255_v22, %v251_v20  ;;  %v250_v27 = vld [vmem:[%s3780_s22 + $0x50] sm:$0xff]  ;;  %v2988_v45 = vld [vmem:[%s4340_s2 + $0x78] sm:$0xff] }
  0x45   : > { %3180 = vmatpush1.bf16.msra.mxu0 %v3799_v13  ;;  %v252_v24 = vld [vmem:[%s3780_s22 + $0x60] sm:$0xff]  ;;  %v254_v28 = vld [vmem:[%s3780_s22 + $0x70] sm:$0xff]  ;;  %299 = vperm.xlu1 %3501, %v269_v29   ;;  %v261_v47 = vld [vmem:[%s3767_s21 + $0x28] sm:$0xff]  ;;  %s4289_s22 = scalar_lea.hbm %s4341_s3, %s3176_s19 }
  0x46   : > { %3188 = vmatpush1.bf16.msra.mxu1 %v3810_v17  ;;  %v3824_v26 = vpack.c.bf16 %v252_v24, %v248_v23  ;;  %3182 = vmatprep.subr.bf16.mxu0 %v3816_v21  ;;  %v3832_v30 = vpack.c.bf16 %v254_v28, %v250_v27  ;;  %v2985_v43 = vld [vmem:[%s4340_s2 + $0x60] sm:$0xff]  ;;  %v2987_v46 = vld [vmem:[%s4340_s2 + $0x70] sm:$0xff]  ;;  %v3014_v48 = vld [vmem:[%s4340_s2 + $0x88] sm:$0xff] }
  0x47   : > { %3190 = vmatprep.subr.bf16.mxu1 %v3822_v25  ;;  %294 = vperm.xlu0 %3500, %v268_v31   ;;  %v260_v44 = vld [vmem:[%s3767_s21 + $0x20] sm:$0xff]  ;;  %v262_v50 = vld [vmem:[%s3767_s21 + $0x30] sm:$0xff]  ;;  %v3016_v51 = vld [vmem:[%s4340_s2 + $0x98] sm:$0xff] }
  0x48   : > { %v3013_v49 = vld [vmem:[%s4340_s2 + $0x80] sm:$0xff]  ;;  %v3015_v52 = vld [vmem:[%s4340_s2 + $0x90] sm:$0xff]  ;;  %v263_v53 = vld [vmem:[%s3767_s21 + $0x38] sm:$0xff] }
  0x49   : > { %3184 = vmatpush1.bf16.msra.mxu0 %v3824_v26  ;;  %309 = vperm.xlu1 %3501, %v271_v33   ;;  %v3018_v54 = vld [vmem:[%s4340_s2 + $0xa8] sm:$0xff]  ;;  %v3017_v55 = vld [vmem:[%s4340_s2 + $0xa0] sm:$0xff]  ;;  %v3020_v56 = vld [vmem:[%s4340_s2 + $0xb8] sm:$0xff] }
  0x4a   : > { %3192 = vmatpush1.bf16.msra.mxu1 %v3832_v30  ;;  %v3019_v57 = vld [vmem:[%s4340_s2 + $0xb0] sm:$0xff]  ;;  %v3046_v58 = vld [vmem:[%s4340_s2 + $0xc8] sm:$0xff]  ;;  %v3045_v59 = vld [vmem:[%s4340_s2 + $0xc0] sm:$0xff] }
  0x4b   : > { %304 = vperm.xlu0 %3500, %v270_v34   ;;  %v3048_v60 = vld [vmem:[%s4340_s2 + $0xd8] sm:$0xff]  ;;  %v3047_v61 = vld [vmem:[%s4340_s2 + $0xd0] sm:$0xff]  ;;  %v3050_v62 = vld [vmem:[%s4340_s2 + $0xe8] sm:$0xff] }
  0x4c   : > { %2957 = vmatmul.mubr.msk.f32.vlgmr.msra.gmra.mrb[0].mxu0 %vm312_vm0, %v256_v32  ;;  %v3049_v63 = vld [vmem:[%s4340_s2 + $0xe0] sm:$0xff]  ;;  %v3052_v0 = vld [vmem:[%s4340_s2 + $0xf8] sm:$0xff]  ;;  %v3051_v2 = vld [vmem:[%s4340_s2 + $0xf0] sm:$0xff] }
  0x4d   : > { %2965 = vmatmul.mubr.msk.f32.vlgmr.msra.gmra.mrb[0].mxu1 %vm312_vm0, %v256_v32  ;;  %407 = vmatprep.mubr.f32.mxu0 %v3628_v1  ;;  %v3078_v3 = vld [vmem:[%s4340_s2 + $0x108] sm:$0xff]  ;;  %v3077_v4 = vld [vmem:[%s4340_s2 + $0x100] sm:$0xff]  ;;  %v3080_v5 = vld [vmem:[%s4340_s2 + $0x118] sm:$0xff] }
  0x4e   : > { %520 = vmatprep.mubr.f32.mxu1 %v3628_v1  ;;  %620 = vperm.xlu1 %3501, %v2982_v36   ;;  %v3079_v6 = vld [vmem:[%s4340_s2 + $0x110] sm:$0xff]  ;;  %v3082_v7 = vld [vmem:[%s4340_s2 + $0x128] sm:$0xff]  ;;  %v3081_v10 = vld [vmem:[%s4340_s2 + $0x120] sm:$0xff] }
  0x4f   : > { %615 = vperm.xlu0 %3500, %v2981_v37   ;;  %v3084_v11 = vld [vmem:[%s4340_s2 + $0x138] sm:$0xff]  ;;  %v3083_v12 = vld [vmem:[%s4340_s2 + $0x130] sm:$0xff]  ;;  %v3110_v14 = vld [vmem:[%s4340_s2 + $0x148] sm:$0xff] }
  0x50   : > { %2958 = vmatmul.mubr.msk.f32.gmra.mrb[2].mxu0 %vm312_vm0, %v257_v35  ;;  %v3109_v15 = vld [vmem:[%s4340_s2 + $0x140] sm:$0xff]  ;;  %v3112_v16 = vld [vmem:[%s4340_s2 + $0x158] sm:$0xff]  ;;  %v3111_v18 = vld [vmem:[%s4340_s2 + $0x150] sm:$0xff] }
  0x51   : > { %2966 = vmatmul.mubr.msk.f32.gmra.mrb[2].mxu1 %vm312_vm0, %v257_v35  ;;  %413 = vmatprep.mubr.f32.mxu0 %v3628_v1  ;;  %v3114_v19 = vld [vmem:[%s4340_s2 + $0x168] sm:$0xff]  ;;  %v3113_v20 = vld [vmem:[%s4340_s2 + $0x160] sm:$0xff]  ;;  %v3116_v22 = vld [vmem:[%s4340_s2 + $0x178] sm:$0xff] }
  0x52   : > { %526 = vmatprep.mubr.f32.mxu1 %v3628_v1  ;;  %630 = vperm.xlu1 %3501, %v2984_v39   ;;  %v3115_v23 = vld [vmem:[%s4340_s2 + $0x170] sm:$0xff]  ;;  %v3142_v24 = vld [vmem:[%s4340_s2 + $0x188] sm:$0xff]  ;;  %v3141_v27 = vld [vmem:[%s4340_s2 + $0x180] sm:$0xff] }
  0x53   : > { %625 = vperm.xlu0 %3500, %v2983_v40   ;;  %v3144_v28 = vld [vmem:[%s4340_s2 + $0x198] sm:$0xff]  ;;  %v3143_v29 = vld [vmem:[%s4340_s2 + $0x190] sm:$0xff]  ;;  %v3146_v31 = vld [vmem:[%s4340_s2 + $0x1a8] sm:$0xff] }
  0x54   : > { %2959 = vmatmul.mubr.msk.f32.gmra.mrb[4].mxu0 %vm312_vm0, %v258_v38  ;;  %v3145_v32 = vld [vmem:[%s4340_s2 + $0x1a0] sm:$0xff]  ;;  %v3148_v33 = vld [vmem:[%s4340_s2 + $0x1b8] sm:$0xff]  ;;  %v3147_v34 = vld [vmem:[%s4340_s2 + $0x1b0] sm:$0xff] }
  0x55   : > { %2967 = vmatmul.mubr.msk.f32.gmra.mrb[4].mxu1 %vm312_vm0, %v258_v38  ;;  %419 = vmatprep.mubr.f32.mxu0 %v3628_v1  ;;  %v3166_v35 = vld [vmem:[%s4340_s2 + $0x1c0] sm:$0x1] }
  0x56   : > { %532 = vmatprep.mubr.f32.mxu1 %v3628_v1  ;;  %640 = vperm.xlu1 %3501, %v2986_v42  }
  0x57   : > { %635 = vperm.xlu0 %3500, %v2985_v43  }
  0x58   : > { %2960 = vmatmul.mubr.msk.f32.gmra.mrb[6].mxu0 %vm312_vm0, %v259_v41 }
  0x59   : > { %2968 = vmatmul.mubr.msk.f32.gmra.mrb[6].mxu1 %vm312_vm0, %v259_v41  ;;  %425 = vmatprep.mubr.f32.mxu0 %v3628_v1 }
  0x5a   : > { %538 = vmatprep.mubr.f32.mxu1 %v3628_v1  ;;  %650 = vperm.xlu1 %3501, %v2988_v45  }
  0x5b   : > { %645 = vperm.xlu0 %3500, %v2987_v46  }
  0x5c   : > { %2961 = vmatmul.mubr.msk.f32.gmra.mrb[8].mxu0 %vm312_vm0, %v260_v44 }
  0x5d   : > { %2969 = vmatmul.mubr.msk.f32.gmra.mrb[8].mxu1 %vm312_vm0, %v260_v44  ;;  %431 = vmatprep.mubr.f32.mxu0 %v3628_v1 }
  0x5e   : > { %544 = vmatprep.mubr.f32.mxu1 %v3628_v1  ;;  %961 = vperm.xlu1 %3501, %v3014_v48  }
  0x5f   : > { %956 = vperm.xlu0 %3500, %v3013_v49  }
  0x60   : > { %2962 = vmatmul.mubr.msk.f32.gmra.mrb[10].mxu0 %vm312_vm0, %v261_v47 }
  0x61   : > { %2970 = vmatmul.mubr.msk.f32.gmra.mrb[10].mxu1 %vm312_vm0, %v261_v47  ;;  %437 = vmatprep.mubr.f32.mxu0 %v3628_v1 }
  0x62   : > { %550 = vmatprep.mubr.f32.mxu1 %v3628_v1  ;;  %971 = vperm.xlu1 %3501, %v3016_v51  }
  0x63   : > { %966 = vperm.xlu0 %3500, %v3015_v52  }
  0x64   : > { %2963 = vmatmul.mubr.msk.f32.gmra.mrb[12].mxu0 %vm312_vm0, %v262_v50 }
  0x65   : > { %2971 = vmatmul.mubr.msk.f32.gmra.mrb[12].mxu1 %vm312_vm0, %v262_v50  ;;  %443 = vmatprep.mubr.f32.mxu0 %v3628_v1 }
  0x66   : > { %556 = vmatprep.mubr.f32.mxu1 %v3628_v1  ;;  %981 = vperm.xlu1 %3501, %v3018_v54  }
  0x67   : > { %976 = vperm.xlu0 %3500, %v3017_v55  }
  0x68   : > { %2964 = vmatmul.mubr.msk.f32.gmra.mrb[14].mxu0 %vm312_vm0, %v263_v53 }
  0x69   : > { %2972 = vmatmul.mubr.msk.f32.gmra.mrb[14].mxu1 %vm312_vm0, %v263_v53  ;;  %742 = vmatprep.mubr.f32.mxu0 %v3628_v1 }
  0x6a   : > { %855 = vmatprep.mubr.f32.mxu1 %v3628_v1  ;;  %991 = vperm.xlu1 %3501, %v3020_v56  }
  0x6b   : > { %986 = vperm.xlu0 %3500, %v3019_v57  }
  0x6e   : > { %1301 = vperm.xlu1 %3501, %v3046_v58  }
  0x6f   : > { %1296 = vperm.xlu0 %3500, %v3045_v59  }
  0x72   : > { %1311 = vperm.xlu1 %3501, %v3048_v60  }
  0x73   : > { %1306 = vperm.xlu0 %3500, %v3047_v61  }
  0x76   : > { %1321 = vperm.xlu1 %3501, %v3050_v62  }
  0x77   : > { %1316 = vperm.xlu0 %3500, %v3049_v63  }
  0x7a   : > { %1331 = vperm.xlu1 %3501, %v3052_v0  }
  0x7b   : > { %1326 = vperm.xlu0 %3500, %v3051_v2  }
  0x7e   : > { %1641 = vperm.xlu1 %3501, %v3078_v3  }
  0x7f   : > { %1636 = vperm.xlu0 %3500, %v3077_v4  }
  0x82   : > { %1651 = vperm.xlu1 %3501, %v3080_v5  }
  0x83   : > { %1646 = vperm.xlu0 %3500, %v3079_v6  }
  0x86   : > { %1661 = vperm.xlu1 %3501, %v3082_v7  }
  0x87   : > { %1656 = vperm.xlu0 %3500, %v3081_v10  }
  0x8a   : > { %1671 = vperm.xlu1 %3501, %v3084_v11  }
  0x8b   : > { %1666 = vperm.xlu0 %3500, %v3083_v12  }
  0x8e   : > { %1982 = vperm.xlu1 %3501, %v3110_v14  }
  0x8f   : > { %1977 = vperm.xlu0 %3500, %v3109_v15  }
  0x92   : > { %1992 = vperm.xlu1 %3501, %v3112_v16  }
  0x93   : > { %1987 = vperm.xlu0 %3500, %v3111_v18  }
  0x96   : > { %2002 = vperm.xlu1 %3501, %v3114_v19  }
  0x97   : > { %1997 = vperm.xlu0 %3500, %v3113_v20  }
  0x9a   : > { %2012 = vperm.xlu1 %3501, %v3116_v22  }
  0x9b   : > { %2007 = vperm.xlu0 %3500, %v3115_v23  }
  0x9e   : > { %2322 = vperm.xlu1 %3501, %v3142_v24  }
  0x9f   : > { %2317 = vperm.xlu0 %3500, %v3141_v27  }
  0xa2   : > { %2332 = vperm.xlu1 %3501, %v3144_v28  }
  0xa3   : > { %2327 = vperm.xlu0 %3500, %v3143_v29  }
  0xa6   : > { %2342 = vperm.xlu1 %3501, %v3146_v31  }
  0xa7   : > { %2337 = vperm.xlu0 %3500, %v3145_v32  }
  0xaa   : > { %2352 = vperm.xlu1 %3501, %v3148_v33  }
  0xab   : > { %2347 = vperm.xlu0 %3500, %v3147_v34  }
  0xaf   : > { %2643 = vperm.xlu0 %3500, %v3166_v35  }
  0xbc   : > { %v275_v36 = vpop.permute.xlu0 %274  ;;  %v285_v50 = vpop.permute.xlu1 %284 }
  0xc0   : > { %v280_v42 = vpop.permute.xlu0 %279  ;;  %v290_v11 = vpop.permute.xlu1 %289 }
 0x11f   : > { %v403_v37 = vpop.f32.mrb[0].mxu0 }
 0x120   : > { %v516_v38 = vpop.f32.mrb[0].mxu1  ;;  %v405_v39 = vpop.f32.mrb[1].mxu0  ;;  %v404_v41 = vadd.f32 %v403_v37, %v275_v36 }
 0x121   : > { %v518_v40 = vpop.f32.mrb[1].mxu1  ;;  %v517_v43 = vadd.f32 %v516_v38, %v275_v36  ;;  %v406_v44 = vadd.f32 %v405_v39, %v275_v36 }
 0x122   : > { %v519_v46 = vadd.f32 %v518_v40, %v275_v36  ;;  %v563_v54 = vmax.f32 %v404_v41, 0.0  ;;  %v295_v41 = vpop.permute.xlu0 %294 }
 0x123   : > { %v409_v45 = vpop.f32.mrb[2].mxu0  ;;  %v565_v57 = vmax.f32 %v517_v43, 0.0  ;;  %v564_v58 = vmax.f32 %v406_v44, 0.0 }
 0x124   : > { %v410_v47 = vadd.f32 %v409_v45, %v280_v42  ;;  %v522_v48 = vpop.f32.mrb[2].mxu1  ;;  %v411_v49 = vpop.f32.mrb[3].mxu0  ;;  %v566_v62 = vmax.f32 %v519_v46, 0.0 }
 0x125   : > { %v523_v51 = vadd.f32 %v522_v48, %v280_v42  ;;  %v412_v52 = vadd.f32 %v411_v49, %v280_v42  ;;  %v524_v53 = vpop.f32.mrb[3].mxu1 }
 0x126   : > { %v567_v55 = vmax.f32 %v410_v47, 0.0  ;;  %v525_v56 = vadd.f32 %v524_v53, %v280_v42  ;;  %v300_v47 = vpop.permute.xlu1 %299 }
 0x127   : > { %v569_v59 = vmax.f32 %v523_v51, 0.0  ;;  %v568_v60 = vmax.f32 %v412_v52, 0.0  ;;  %v415_v61 = vpop.f32.mrb[4].mxu0 }
 0x128   : > { %v3195_v63 = vpack.c.bf16 %v567_v55, %v563_v54  ;;  %v570_v0 = vmax.f32 %v525_v56, 0.0  ;;  %v528_v2 = vpop.f32.mrb[4].mxu1  ;;  %v417_v3 = vpop.f32.mrb[5].mxu0  ;;  %v416_v10 = vadd.f32 %v415_v61, %v285_v50 }
 0x129   : > { %v3211_v4 = vpack.c.bf16 %v569_v59, %v565_v57  ;;  %v3193_v5 = vpack.c.bf16 %v568_v60, %v564_v58  ;;  %v530_v6 = vpop.f32.mrb[5].mxu1  ;;  %v529_v12 = vadd.f32 %v528_v2, %v285_v50  ;;  %v418_v14 = vadd.f32 %v417_v3, %v285_v50 }
 0x12a   : > { %v3209_v7 = vpack.c.bf16 %v570_v0, %v566_v62  ;;  %v531_v16 = vadd.f32 %v530_v6, %v285_v50  ;;  %v571_v27 = vmax.f32 %v416_v10, 0.0  ;;  %v305_v10 = vpop.permute.xlu0 %304 }
 0x12b   : > { %v421_v15 = vpop.f32.mrb[6].mxu0  ;;  %3194 = vmatprep.subr.bf16.mxu0 %v3193_v5  ;;  %v573_v31 = vmax.f32 %v529_v12, 0.0  ;;  %v572_v32 = vmax.f32 %v418_v14, 0.0 }
 0x12c   : > { %v422_v18 = vadd.f32 %v421_v15, %v290_v11  ;;  %v534_v19 = vpop.f32.mrb[6].mxu1  ;;  %3210 = vmatprep.subr.bf16.mxu1 %v3209_v7  ;;  %v423_v20 = vpop.f32.mrb[7].mxu0  ;;  %3196 = vmatpush1.bf16.msra.mxu0 %v3195_v63  ;;  %v574_v36 = vmax.f32 %v531_v16, 0.0 }
 0x12d   : > { %v535_v22 = vadd.f32 %v534_v19, %v290_v11  ;;  %v424_v23 = vadd.f32 %v423_v20, %v290_v11  ;;  %v536_v24 = vpop.f32.mrb[7].mxu1  ;;  %3212 = vmatpush1.bf16.msra.mxu1 %v3211_v4 }
 0x12e   : > { %v575_v28 = vmax.f32 %v422_v18, 0.0  ;;  %v537_v29 = vadd.f32 %v536_v24, %v290_v11  ;;  %v310_v18 = vpop.permute.xlu1 %309 }
 0x12f   : > { %v577_v33 = vmax.f32 %v535_v22, 0.0  ;;  %v576_v34 = vmax.f32 %v424_v23, 0.0  ;;  %v427_v35 = vpop.f32.mrb[8].mxu0 }
 0x130   : > { %v3199_v37 = vpack.c.bf16 %v575_v28, %v571_v27  ;;  %v578_v38 = vmax.f32 %v537_v29, 0.0  ;;  %v540_v39 = vpop.f32.mrb[8].mxu1  ;;  %v429_v40 = vpop.f32.mrb[9].mxu0  ;;  %v428_v46 = vadd.f32 %v427_v35, %v295_v41 }
 0x131   : > { %v3215_v42 = vpack.c.bf16 %v577_v33, %v573_v31  ;;  %v3197_v43 = vpack.c.bf16 %v576_v34, %v572_v32  ;;  %v542_v44 = vpop.f32.mrb[9].mxu1  ;;  %v541_v48 = vadd.f32 %v540_v39, %v295_v41  ;;  %v430_v49 = vadd.f32 %v429_v40, %v295_v41 }
 0x132   : > { %v3213_v45 = vpack.c.bf16 %v578_v38, %v574_v36  ;;  %v543_v51 = vadd.f32 %v542_v44, %v295_v41  ;;  %v579_v58 = vmax.f32 %v428_v46, 0.0  ;;  %v2973_v46 = vld [vmem:[%s3767_s21 + $0x40] sm:$0xff] }
 0x133   : > { %v433_v50 = vpop.f32.mrb[10].mxu0  ;;  %3198 = vmatprep.subr.bf16.mxu0 %v3197_v43  ;;  %v581_v61 = vmax.f32 %v541_v48, 0.0  ;;  %v580_v62 = vmax.f32 %v430_v49, 0.0  ;;  %v2975_v48 = vld [vmem:[%s3767_s21 + $0x50] sm:$0xff]  ;;  %v2976_v49 = vld [vmem:[%s3767_s21 + $0x58] sm:$0xff] }
 0x134   : > { %v434_v52 = vadd.f32 %v433_v50, %v300_v47  ;;  %v546_v53 = vpop.f32.mrb[10].mxu1  ;;  %3214 = vmatprep.subr.bf16.mxu1 %v3213_v45  ;;  %v435_v54 = vpop.f32.mrb[11].mxu0  ;;  %3200 = vmatpush1.bf16.msra.mxu0 %v3199_v37  ;;  %v582_v3 = vmax.f32 %v543_v51, 0.0  ;;  %v2977_v50 = vld [vmem:[%s3767_s21 + $0x60] sm:$0xff]  ;;  %v2978_v51 = vld [vmem:[%s3767_s21 + $0x68] sm:$0xff] }
 0x135   : > { %v547_v55 = vadd.f32 %v546_v53, %v300_v47  ;;  %v436_v56 = vadd.f32 %v435_v54, %v300_v47  ;;  %v548_v57 = vpop.f32.mrb[11].mxu1  ;;  %3216 = vmatpush1.bf16.msra.mxu1 %v3215_v42  ;;  %v2980_v53 = vld [vmem:[%s3767_s21 + $0x78] sm:$0xff] }
 0x136   : > { %v583_v59 = vmax.f32 %v434_v52, 0.0  ;;  %v549_v60 = vadd.f32 %v548_v57, %v300_v47  ;;  %v2974_v47 = vld [vmem:[%s3767_s21 + $0x48] sm:$0xff]  ;;  %v2979_v52 = vld [vmem:[%s3767_s21 + $0x70] sm:$0xff]  ;;  %v616_v57 = vpop.permute.xlu0 %615 }
 0x137   : > { %v585_v63 = vmax.f32 %v547_v55, 0.0  ;;  %v584_v0 = vmax.f32 %v436_v56, 0.0  ;;  %v439_v2 = vpop.f32.mrb[12].mxu0 }
 0x138   : > { %v3203_v4 = vpack.c.bf16 %v583_v59, %v579_v58  ;;  %v586_v5 = vmax.f32 %v549_v60, 0.0  ;;  %v552_v6 = vpop.f32.mrb[12].mxu1  ;;  %v441_v7 = vpop.f32.mrb[13].mxu0  ;;  %v440_v16 = vadd.f32 %v439_v2, %v305_v10 }
 0x139   : > { %v3219_v11 = vpack.c.bf16 %v585_v63, %v581_v61  ;;  %v3201_v12 = vpack.c.bf16 %v584_v0, %v580_v62  ;;  %v554_v14 = vpop.f32.mrb[13].mxu1  ;;  %v553_v19 = vadd.f32 %v552_v6, %v305_v10  ;;  %v442_v20 = vadd.f32 %v441_v7, %v305_v10  ;;  %v621_v60 = vpop.permute.xlu1 %620 }
 0x13a   : > { %v3217_v15 = vpack.c.bf16 %v586_v5, %v582_v3  ;;  %v555_v23 = vadd.f32 %v554_v14, %v305_v10  ;;  %v587_v33 = vmax.f32 %v440_v16, 0.0 }
 0x13b   : > { %v445_v22 = vpop.f32.mrb[14].mxu0  ;;  %3202 = vmatprep.subr.bf16.mxu0 %v3201_v12  ;;  %v589_v36 = vmax.f32 %v553_v19, 0.0  ;;  %v588_v37 = vmax.f32 %v442_v20, 0.0 }
 0x13c   : > { %v446_v24 = vadd.f32 %v445_v22, %v310_v18  ;;  %v558_v27 = vpop.f32.mrb[14].mxu1  ;;  %3218 = vmatprep.subr.bf16.mxu1 %v3217_v15  ;;  %v447_v28 = vpop.f32.mrb[15].mxu0  ;;  %3204 = vmatpush1.bf16.msra.mxu0 %v3203_v4  ;;  %v590_v40 = vmax.f32 %v555_v23, 0.0 }
 0x13d   : > { %v559_v29 = vadd.f32 %v558_v27, %v310_v18  ;;  %v448_v31 = vadd.f32 %v447_v28, %v310_v18  ;;  %v560_v32 = vpop.f32.mrb[15].mxu1  ;;  %3220 = vmatpush1.bf16.msra.mxu1 %v3219_v11  ;;  %v626_v28 = vpop.permute.xlu0 %625 }
 0x13e   : > { %v591_v34 = vmax.f32 %v446_v24, 0.0  ;;  %v561_v35 = vadd.f32 %v560_v32, %v310_v18 }
 0x13f   : > { %v593_v38 = vmax.f32 %v559_v29, 0.0  ;;  %v592_v39 = vmax.f32 %v448_v31, 0.0 }
 0x140   : > { %v3207_v41 = vpack.c.bf16 %v591_v34, %v587_v33  ;;  %v594_v42 = vmax.f32 %v561_v35, 0.0  ;;  %v631_v35 = vpop.permute.xlu1 %630 }
 0x141   : > { %v3223_v43 = vpack.c.bf16 %v593_v38, %v589_v36  ;;  %v3205_v44 = vpack.c.bf16 %v592_v39, %v588_v37 }
 0x142   : > { %v3221_v45 = vpack.c.bf16 %v594_v42, %v590_v40 }
 0x143   : > { %3206 = vmatprep.subr.bf16.mxu0 %v3205_v44 }
 0x144   : > { %3222 = vmatprep.subr.bf16.mxu1 %v3221_v45  ;;  %3208 = vmatpush1.bf16.msra.mxu0 %v3207_v41 }
 0x145   : > { %3224 = vmatpush1.bf16.msra.mxu1 %v3223_v43 }
 0x147   : > { %2989 = vmatmul.mubr.msk.f32.vlgmr.msra.gmra.mrb[16].mxu0 %vm653_vm1, %v2973_v46 }
 0x148   : > { %2997 = vmatmul.mubr.msk.f32.vlgmr.msra.gmra.mrb[16].mxu1 %vm653_vm1, %v2973_v46  ;;  %748 = vmatprep.mubr.f32.mxu0 %v3628_v1 }
 0x149   : > { %861 = vmatprep.mubr.f32.mxu1 %v3628_v1 }
 0x14b   : > { %2990 = vmatmul.mubr.msk.f32.gmra.mrb[18].mxu0 %vm653_vm1, %v2974_v47 }
 0x14c   : > { %2998 = vmatmul.mubr.msk.f32.gmra.mrb[18].mxu1 %vm653_vm1, %v2974_v47  ;;  %754 = vmatprep.mubr.f32.mxu0 %v3628_v1 }
 0x14d   : > { %867 = vmatprep.mubr.f32.mxu1 %v3628_v1 }
 0x14f   : > { %2991 = vmatmul.mubr.msk.f32.gmra.mrb[20].mxu0 %vm653_vm1, %v2975_v48 }
 0x150   : > { %2999 = vmatmul.mubr.msk.f32.gmra.mrb[20].mxu1 %vm653_vm1, %v2975_v48  ;;  %760 = vmatprep.mubr.f32.mxu0 %v3628_v1 }
 0x151   : > { %873 = vmatprep.mubr.f32.mxu1 %v3628_v1 }
 0x153   : > { %2992 = vmatmul.mubr.msk.f32.gmra.mrb[22].mxu0 %vm653_vm1, %v2976_v49 }
 0x154   : > { %3000 = vmatmul.mubr.msk.f32.gmra.mrb[22].mxu1 %vm653_vm1, %v2976_v49  ;;  %766 = vmatprep.mubr.f32.mxu0 %v3628_v1 }
 0x155   : > { %879 = vmatprep.mubr.f32.mxu1 %v3628_v1 }
 0x157   : > { %2993 = vmatmul.mubr.msk.f32.gmra.mrb[24].mxu0 %vm653_vm1, %v2977_v50 }
 0x158   : > { %3001 = vmatmul.mubr.msk.f32.gmra.mrb[24].mxu1 %vm653_vm1, %v2977_v50  ;;  %772 = vmatprep.mubr.f32.mxu0 %v3628_v1 }
 0x159   : > { %885 = vmatprep.mubr.f32.mxu1 %v3628_v1 }
 0x15b   : > { %2994 = vmatmul.mubr.msk.f32.gmra.mrb[26].mxu0 %vm653_vm1, %v2978_v51 }
 0x15c   : > { %3002 = vmatmul.mubr.msk.f32.gmra.mrb[26].mxu1 %vm653_vm1, %v2978_v51  ;;  %778 = vmatprep.mubr.f32.mxu0 %v3628_v1 }
 0x15d   : > { %891 = vmatprep.mubr.f32.mxu1 %v3628_v1 }
 0x15f   : > { %2995 = vmatmul.mubr.msk.f32.gmra.mrb[28].mxu0 %vm653_vm1, %v2979_v52 }
 0x160   : > { %3003 = vmatmul.mubr.msk.f32.gmra.mrb[28].mxu1 %vm653_vm1, %v2979_v52  ;;  %784 = vmatprep.mubr.f32.mxu0 %v3628_v1 }
 0x161   : > { %897 = vmatprep.mubr.f32.mxu1 %v3628_v1 }
 0x163   : > { %2996 = vmatmul.mubr.msk.f32.gmra.mrb[30].mxu0 %vm653_vm1, %v2980_v53 }
 0x164   : > { %3004 = vmatmul.mubr.msk.f32.gmra.mrb[30].mxu1 %vm653_vm1, %v2980_v53  ;;  %1082 = vmatprep.mubr.f32.mxu0 %v3628_v1 }
 0x165   : > { %1195 = vmatprep.mubr.f32.mxu1 %v3628_v1 }
 0x21a   : > { %v744_v54 = vpop.f32.mrb[16].mxu0 }
 0x21b   : > { %v857_v55 = vpop.f32.mrb[16].mxu1  ;;  %v746_v56 = vpop.f32.mrb[17].mxu0  ;;  %v745_v59 = vadd.f32 %v744_v54, %v616_v57 }
 0x21c   : > { %v859_v58 = vpop.f32.mrb[17].mxu1  ;;  %v858_v61 = vadd.f32 %v857_v55, %v616_v57  ;;  %v747_v62 = vadd.f32 %v746_v56, %v616_v57 }
 0x21d   : > { %v860_v0 = vadd.f32 %v859_v58, %v616_v57  ;;  %v904_v10 = vmax.f32 %v745_v59, 0.0  ;;  %v636_v59 = vpop.permute.xlu0 %635 }
 0x21e   : > { %v750_v63 = vpop.f32.mrb[18].mxu0  ;;  %v906_v14 = vmax.f32 %v858_v61, 0.0  ;;  %v905_v15 = vmax.f32 %v747_v62, 0.0 }
 0x21f   : > { %v751_v2 = vadd.f32 %v750_v63, %v621_v60  ;;  %v863_v3 = vpop.f32.mrb[18].mxu1  ;;  %v752_v4 = vpop.f32.mrb[19].mxu0  ;;  %v907_v20 = vmax.f32 %v860_v0, 0.0 }
 0x220   : > { %v864_v5 = vadd.f32 %v863_v3, %v621_v60  ;;  %v753_v6 = vadd.f32 %v752_v4, %v621_v60  ;;  %v865_v7 = vpop.f32.mrb[19].mxu1 }
 0x221   : > { %v908_v11 = vmax.f32 %v751_v2, 0.0  ;;  %v866_v12 = vadd.f32 %v865_v7, %v621_v60  ;;  %v641_v2 = vpop.permute.xlu1 %640 }
 0x222   : > { %v910_v16 = vmax.f32 %v864_v5, 0.0  ;;  %v909_v18 = vmax.f32 %v753_v6, 0.0  ;;  %v756_v19 = vpop.f32.mrb[20].mxu0 }
 0x223   : > { %v3227_v22 = vpack.c.bf16 %v908_v11, %v904_v10  ;;  %v911_v23 = vmax.f32 %v866_v12, 0.0  ;;  %v869_v24 = vpop.f32.mrb[20].mxu1  ;;  %v758_v27 = vpop.f32.mrb[21].mxu0  ;;  %v757_v34 = vadd.f32 %v756_v19, %v626_v28 }
 0x224   : > { %v3243_v29 = vpack.c.bf16 %v910_v16, %v906_v14  ;;  %v3225_v31 = vpack.c.bf16 %v909_v18, %v905_v15  ;;  %v871_v32 = vpop.f32.mrb[21].mxu1  ;;  %v870_v36 = vadd.f32 %v869_v24, %v626_v28  ;;  %v759_v37 = vadd.f32 %v758_v27, %v626_v28 }
 0x225   : > { %v3241_v33 = vpack.c.bf16 %v911_v23, %v907_v20  ;;  %v872_v39 = vadd.f32 %v871_v32, %v626_v28  ;;  %v912_v46 = vmax.f32 %v757_v34, 0.0  ;;  %v646_v34 = vpop.permute.xlu0 %645 }
 0x226   : > { %v762_v38 = vpop.f32.mrb[22].mxu0  ;;  %3226 = vmatprep.subr.bf16.mxu0 %v3225_v31  ;;  %v914_v49 = vmax.f32 %v870_v36, 0.0  ;;  %v913_v50 = vmax.f32 %v759_v37, 0.0 }
 0x227   : > { %v763_v40 = vadd.f32 %v762_v38, %v631_v35  ;;  %v875_v41 = vpop.f32.mrb[22].mxu1  ;;  %3242 = vmatprep.subr.bf16.mxu1 %v3241_v33  ;;  %v764_v42 = vpop.f32.mrb[23].mxu0  ;;  %3228 = vmatpush1.bf16.msra.mxu0 %v3227_v22  ;;  %v915_v54 = vmax.f32 %v872_v39, 0.0 }
 0x228   : > { %v876_v43 = vadd.f32 %v875_v41, %v631_v35  ;;  %v765_v44 = vadd.f32 %v764_v42, %v631_v35  ;;  %v877_v45 = vpop.f32.mrb[23].mxu1  ;;  %3244 = vmatpush1.bf16.msra.mxu1 %v3243_v29 }
 0x229   : > { %v916_v47 = vmax.f32 %v763_v40, 0.0  ;;  %v878_v48 = vadd.f32 %v877_v45, %v631_v35  ;;  %v651_v40 = vpop.permute.xlu1 %650 }
 0x22a   : > { %v918_v51 = vmax.f32 %v876_v43, 0.0  ;;  %v917_v52 = vmax.f32 %v765_v44, 0.0  ;;  %v768_v53 = vpop.f32.mrb[24].mxu0 }
 0x22b   : > { %v3231_v55 = vpack.c.bf16 %v916_v47, %v912_v46  ;;  %v919_v56 = vmax.f32 %v878_v48, 0.0  ;;  %v881_v57 = vpop.f32.mrb[24].mxu1  ;;  %v770_v58 = vpop.f32.mrb[25].mxu0  ;;  %v769_v0 = vadd.f32 %v768_v53, %v636_v59 }
 0x22c   : > { %v3247_v60 = vpack.c.bf16 %v918_v51, %v914_v49  ;;  %v3229_v61 = vpack.c.bf16 %v917_v52, %v913_v50  ;;  %v883_v62 = vpop.f32.mrb[25].mxu1  ;;  %v882_v3 = vadd.f32 %v881_v57, %v636_v59  ;;  %v771_v4 = vadd.f32 %v770_v58, %v636_v59 }
 0x22d   : > { %v3245_v63 = vpack.c.bf16 %v919_v56, %v915_v54  ;;  %v884_v6 = vadd.f32 %v883_v62, %v636_v59  ;;  %v920_v16 = vmax.f32 %v769_v0, 0.0  ;;  %v3005_v0 = vld [vmem:[%s3767_s21 + $0x80] sm:$0xff] }
 0x22e   : > { %v774_v5 = vpop.f32.mrb[26].mxu0  ;;  %3230 = vmatprep.subr.bf16.mxu0 %v3229_v61  ;;  %v922_v20 = vmax.f32 %v882_v3, 0.0  ;;  %v921_v22 = vmax.f32 %v771_v4, 0.0  ;;  %v3007_v3 = vld [vmem:[%s3767_s21 + $0x90] sm:$0xff]  ;;  %v3008_v4 = vld [vmem:[%s3767_s21 + $0x98] sm:$0xff] }
 0x22f   : > { %v775_v7 = vadd.f32 %v774_v5, %v641_v2  ;;  %v887_v10 = vpop.f32.mrb[26].mxu1  ;;  %3246 = vmatprep.subr.bf16.mxu1 %v3245_v63  ;;  %v776_v11 = vpop.f32.mrb[27].mxu0  ;;  %3232 = vmatpush1.bf16.msra.mxu0 %v3231_v55  ;;  %v923_v28 = vmax.f32 %v884_v6, 0.0  ;;  %v3009_v5 = vld [vmem:[%s3767_s21 + $0xa0] sm:$0xff]  ;;  %v3010_v6 = vld [vmem:[%s3767_s21 + $0xa8] sm:$0xff] }
 0x230   : > { %v888_v12 = vadd.f32 %v887_v10, %v641_v2  ;;  %v777_v14 = vadd.f32 %v776_v11, %v641_v2  ;;  %v889_v15 = vpop.f32.mrb[27].mxu1  ;;  %3248 = vmatpush1.bf16.msra.mxu1 %v3247_v60  ;;  %v3012_v10 = vld [vmem:[%s3767_s21 + $0xb8] sm:$0xff] }
 0x231   : > { %v924_v18 = vmax.f32 %v775_v7, 0.0  ;;  %v890_v19 = vadd.f32 %v889_v15, %v641_v2  ;;  %v3006_v2 = vld [vmem:[%s3767_s21 + $0x88] sm:$0xff]  ;;  %v3011_v7 = vld [vmem:[%s3767_s21 + $0xb0] sm:$0xff]  ;;  %v957_v15 = vpop.permute.xlu0 %956 }
 0x232   : > { %v926_v23 = vmax.f32 %v888_v12, 0.0  ;;  %v925_v24 = vmax.f32 %v777_v14, 0.0  ;;  %v780_v27 = vpop.f32.mrb[28].mxu0 }
 0x233   : > { %v3235_v29 = vpack.c.bf16 %v924_v18, %v920_v16  ;;  %v927_v31 = vmax.f32 %v890_v19, 0.0  ;;  %v893_v32 = vpop.f32.mrb[28].mxu1  ;;  %v782_v33 = vpop.f32.mrb[29].mxu0  ;;  %v781_v39 = vadd.f32 %v780_v27, %v646_v34 }
 0x234   : > { %v3251_v35 = vpack.c.bf16 %v926_v23, %v922_v20  ;;  %v3233_v36 = vpack.c.bf16 %v925_v24, %v921_v22  ;;  %v895_v37 = vpop.f32.mrb[29].mxu1  ;;  %v894_v41 = vadd.f32 %v893_v32, %v646_v34  ;;  %v783_v42 = vadd.f32 %v782_v33, %v646_v34  ;;  %v962_v19 = vpop.permute.xlu1 %961 }
 0x235   : > { %v3249_v38 = vpack.c.bf16 %v927_v31, %v923_v28  ;;  %v896_v44 = vadd.f32 %v895_v37, %v646_v34  ;;  %v928_v51 = vmax.f32 %v781_v39, 0.0 }
 0x236   : > { %v786_v43 = vpop.f32.mrb[30].mxu0  ;;  %3234 = vmatprep.subr.bf16.mxu0 %v3233_v36  ;;  %v930_v54 = vmax.f32 %v894_v41, 0.0  ;;  %v929_v55 = vmax.f32 %v783_v42, 0.0 }
 0x237   : > { %v787_v45 = vadd.f32 %v786_v43, %v651_v40  ;;  %v899_v46 = vpop.f32.mrb[30].mxu1  ;;  %3250 = vmatprep.subr.bf16.mxu1 %v3249_v38  ;;  %v788_v47 = vpop.f32.mrb[31].mxu0  ;;  %3236 = vmatpush1.bf16.msra.mxu0 %v3235_v29  ;;  %v931_v58 = vmax.f32 %v896_v44, 0.0 }
 0x238   : > { %v900_v48 = vadd.f32 %v899_v46, %v651_v40  ;;  %v789_v49 = vadd.f32 %v788_v47, %v651_v40  ;;  %v901_v50 = vpop.f32.mrb[31].mxu1  ;;  %3252 = vmatpush1.bf16.msra.mxu1 %v3251_v35  ;;  %v967_v47 = vpop.permute.xlu0 %966 }
 0x239   : > { %v932_v52 = vmax.f32 %v787_v45, 0.0  ;;  %v902_v53 = vadd.f32 %v901_v50, %v651_v40 }
 0x23a   : > { %v934_v56 = vmax.f32 %v900_v48, 0.0  ;;  %v933_v57 = vmax.f32 %v789_v49, 0.0 }
 0x23b   : > { %v3239_v59 = vpack.c.bf16 %v932_v52, %v928_v51  ;;  %v935_v60 = vmax.f32 %v902_v53, 0.0  ;;  %v972_v53 = vpop.permute.xlu1 %971 }
 0x23c   : > { %v3255_v61 = vpack.c.bf16 %v934_v56, %v930_v54  ;;  %v3237_v62 = vpack.c.bf16 %v933_v57, %v929_v55 }
 0x23d   : > { %v3253_v63 = vpack.c.bf16 %v935_v60, %v931_v58 }
 0x23e   : > { %3238 = vmatprep.subr.bf16.mxu0 %v3237_v62 }
 0x23f   : > { %3254 = vmatprep.subr.bf16.mxu1 %v3253_v63  ;;  %3240 = vmatpush1.bf16.msra.mxu0 %v3239_v59 }
 0x240   : > { %3256 = vmatpush1.bf16.msra.mxu1 %v3255_v61 }
 0x242   : > { %3021 = vmatmul.mubr.msk.f32.vlgmr.msra.gmra.mrb[32].mxu0 %vm653_vm1, %v3005_v0 }
 0x243   : > { %3029 = vmatmul.mubr.msk.f32.vlgmr.msra.gmra.mrb[32].mxu1 %vm653_vm1, %v3005_v0  ;;  %1088 = vmatprep.mubr.f32.mxu0 %v3628_v1 }
 0x244   : > { %1201 = vmatprep.mubr.f32.mxu1 %v3628_v1 }
 0x246   : > { %3022 = vmatmul.mubr.msk.f32.gmra.mrb[34].mxu0 %vm653_vm1, %v3006_v2 }
 0x247   : > { %3030 = vmatmul.mubr.msk.f32.gmra.mrb[34].mxu1 %vm653_vm1, %v3006_v2  ;;  %1094 = vmatprep.mubr.f32.mxu0 %v3628_v1 }
 0x248   : > { %1207 = vmatprep.mubr.f32.mxu1 %v3628_v1 }
 0x24a   : > { %3023 = vmatmul.mubr.msk.f32.gmra.mrb[36].mxu0 %vm653_vm1, %v3007_v3 }
 0x24b   : > { %3031 = vmatmul.mubr.msk.f32.gmra.mrb[36].mxu1 %vm653_vm1, %v3007_v3  ;;  %1100 = vmatprep.mubr.f32.mxu0 %v3628_v1 }
 0x24c   : > { %1213 = vmatprep.mubr.f32.mxu1 %v3628_v1 }
 0x24e   : > { %3024 = vmatmul.mubr.msk.f32.gmra.mrb[38].mxu0 %vm653_vm1, %v3008_v4 }
 0x24f   : > { %3032 = vmatmul.mubr.msk.f32.gmra.mrb[38].mxu1 %vm653_vm1, %v3008_v4  ;;  %1106 = vmatprep.mubr.f32.mxu0 %v3628_v1 }
 0x250   : > { %1219 = vmatprep.mubr.f32.mxu1 %v3628_v1 }
 0x252   : > { %3025 = vmatmul.mubr.msk.f32.gmra.mrb[40].mxu0 %vm653_vm1, %v3009_v5 }
 0x253   : > { %3033 = vmatmul.mubr.msk.f32.gmra.mrb[40].mxu1 %vm653_vm1, %v3009_v5  ;;  %1112 = vmatprep.mubr.f32.mxu0 %v3628_v1 }
 0x254   : > { %1225 = vmatprep.mubr.f32.mxu1 %v3628_v1 }
 0x256   : > { %3026 = vmatmul.mubr.msk.f32.gmra.mrb[42].mxu0 %vm653_vm1, %v3010_v6 }
 0x257   : > { %3034 = vmatmul.mubr.msk.f32.gmra.mrb[42].mxu1 %vm653_vm1, %v3010_v6  ;;  %1118 = vmatprep.mubr.f32.mxu0 %v3628_v1 }
 0x258   : > { %1231 = vmatprep.mubr.f32.mxu1 %v3628_v1 }
 0x25a   : > { %3027 = vmatmul.mubr.msk.f32.gmra.mrb[44].mxu0 %vm653_vm1, %v3011_v7 }
 0x25b   : > { %3035 = vmatmul.mubr.msk.f32.gmra.mrb[44].mxu1 %vm653_vm1, %v3011_v7  ;;  %1124 = vmatprep.mubr.f32.mxu0 %v3628_v1 }
 0x25c   : > { %1237 = vmatprep.mubr.f32.mxu1 %v3628_v1 }
 0x25e   : > { %3028 = vmatmul.mubr.msk.f32.gmra.mrb[46].mxu0 %vm653_vm1, %v3012_v10 }
 0x25f   : > { %3036 = vmatmul.mubr.msk.f32.gmra.mrb[46].mxu1 %vm653_vm1, %v3012_v10  ;;  %1422 = vmatprep.mubr.f32.mxu0 %v3628_v1 }
 0x260   : > { %1535 = vmatprep.mubr.f32.mxu1 %v3628_v1 }
 0x315   : > { %v1084_v11 = vpop.f32.mrb[32].mxu0 }
 0x316   : > { %v1197_v12 = vpop.f32.mrb[32].mxu1  ;;  %v1086_v14 = vpop.f32.mrb[33].mxu0  ;;  %v1085_v18 = vadd.f32 %v1084_v11, %v957_v15 }
 0x317   : > { %v1199_v16 = vpop.f32.mrb[33].mxu1  ;;  %v1198_v20 = vadd.f32 %v1197_v12, %v957_v15  ;;  %v1087_v22 = vadd.f32 %v1086_v14, %v957_v15 }
 0x318   : > { %v1200_v24 = vadd.f32 %v1199_v16, %v957_v15  ;;  %v1244_v34 = vmax.f32 %v1085_v18, 0.0  ;;  %v977_v18 = vpop.permute.xlu0 %976 }
 0x319   : > { %v1090_v23 = vpop.f32.mrb[34].mxu0  ;;  %v1246_v37 = vmax.f32 %v1198_v20, 0.0  ;;  %v1245_v38 = vmax.f32 %v1087_v22, 0.0 }
 0x31a   : > { %v1091_v27 = vadd.f32 %v1090_v23, %v962_v19  ;;  %v1203_v28 = vpop.f32.mrb[34].mxu1  ;;  %v1092_v29 = vpop.f32.mrb[35].mxu0  ;;  %v1247_v42 = vmax.f32 %v1200_v24, 0.0 }
 0x31b   : > { %v1204_v31 = vadd.f32 %v1203_v28, %v962_v19  ;;  %v1093_v32 = vadd.f32 %v1092_v29, %v962_v19  ;;  %v1205_v33 = vpop.f32.mrb[35].mxu1 }
 0x31c   : > { %v1248_v35 = vmax.f32 %v1091_v27, 0.0  ;;  %v1206_v36 = vadd.f32 %v1205_v33, %v962_v19  ;;  %v982_v27 = vpop.permute.xlu1 %981 }
 0x31d   : > { %v1250_v39 = vmax.f32 %v1204_v31, 0.0  ;;  %v1249_v40 = vmax.f32 %v1093_v32, 0.0  ;;  %v1096_v41 = vpop.f32.mrb[36].mxu0 }
 0x31e   : > { %v3259_v43 = vpack.c.bf16 %v1248_v35, %v1244_v34  ;;  %v1251_v44 = vmax.f32 %v1206_v36, 0.0  ;;  %v1209_v45 = vpop.f32.mrb[36].mxu1  ;;  %v1098_v46 = vpop.f32.mrb[37].mxu0  ;;  %v1097_v52 = vadd.f32 %v1096_v41, %v967_v47 }
 0x31f   : > { %v3275_v48 = vpack.c.bf16 %v1250_v39, %v1246_v37  ;;  %v3257_v49 = vpack.c.bf16 %v1249_v40, %v1245_v38  ;;  %v1211_v50 = vpop.f32.mrb[37].mxu1  ;;  %v1210_v54 = vadd.f32 %v1209_v45, %v967_v47  ;;  %v1099_v55 = vadd.f32 %v1098_v46, %v967_v47 }
 0x320   : > { %v3273_v51 = vpack.c.bf16 %v1251_v44, %v1247_v42  ;;  %v1212_v57 = vadd.f32 %v1211_v50, %v967_v47  ;;  %v1252_v0 = vmax.f32 %v1097_v52, 0.0  ;;  %v987_v52 = vpop.permute.xlu0 %986 }
 0x321   : > { %v1102_v56 = vpop.f32.mrb[38].mxu0  ;;  %3258 = vmatprep.subr.bf16.mxu0 %v3257_v49  ;;  %v1254_v4 = vmax.f32 %v1210_v54, 0.0  ;;  %v1253_v5 = vmax.f32 %v1099_v55, 0.0 }
 0x322   : > { %v1103_v58 = vadd.f32 %v1102_v56, %v972_v53  ;;  %v1215_v59 = vpop.f32.mrb[38].mxu1  ;;  %3274 = vmatprep.subr.bf16.mxu1 %v3273_v51  ;;  %v1104_v60 = vpop.f32.mrb[39].mxu0  ;;  %3260 = vmatpush1.bf16.msra.mxu0 %v3259_v43  ;;  %v1255_v11 = vmax.f32 %v1212_v57, 0.0 }
 0x323   : > { %v1216_v61 = vadd.f32 %v1215_v59, %v972_v53  ;;  %v1105_v62 = vadd.f32 %v1104_v60, %v972_v53  ;;  %v1217_v63 = vpop.f32.mrb[39].mxu1  ;;  %3276 = vmatpush1.bf16.msra.mxu1 %v3275_v48 }
 0x324   : > { %v1256_v2 = vmax.f32 %v1103_v58, 0.0  ;;  %v1218_v3 = vadd.f32 %v1217_v63, %v972_v53  ;;  %v992_v58 = vpop.permute.xlu1 %991 }
 0x325   : > { %v1258_v6 = vmax.f32 %v1216_v61, 0.0  ;;  %v1257_v7 = vmax.f32 %v1105_v62, 0.0  ;;  %v1108_v10 = vpop.f32.mrb[40].mxu0 }
 0x326   : > { %v3263_v12 = vpack.c.bf16 %v1256_v2, %v1252_v0  ;;  %v1259_v14 = vmax.f32 %v1218_v3, 0.0  ;;  %v1221_v15 = vpop.f32.mrb[40].mxu1  ;;  %v1110_v16 = vpop.f32.mrb[41].mxu0  ;;  %v1109_v24 = vadd.f32 %v1108_v10, %v977_v18 }
 0x327   : > { %v3279_v19 = vpack.c.bf16 %v1258_v6, %v1254_v4  ;;  %v3261_v20 = vpack.c.bf16 %v1257_v7, %v1253_v5  ;;  %v1223_v22 = vpop.f32.mrb[41].mxu1  ;;  %v1222_v28 = vadd.f32 %v1221_v15, %v977_v18  ;;  %v1111_v29 = vadd.f32 %v1110_v16, %v977_v18 }
 0x328   : > { %v3277_v23 = vpack.c.bf16 %v1259_v14, %v1255_v11  ;;  %v1224_v32 = vadd.f32 %v1223_v22, %v977_v18  ;;  %v1260_v39 = vmax.f32 %v1109_v24, 0.0  ;;  %v3037_v24 = vld [vmem:[%s3767_s21 + $0xc0] sm:$0xff] }
 0x329   : > { %v1114_v31 = vpop.f32.mrb[42].mxu0  ;;  %3262 = vmatprep.subr.bf16.mxu0 %v3261_v20  ;;  %v1262_v42 = vmax.f32 %v1222_v28, 0.0  ;;  %v1261_v43 = vmax.f32 %v1111_v29, 0.0  ;;  %v3039_v28 = vld [vmem:[%s3767_s21 + $0xd0] sm:$0xff]  ;;  %v3040_v29 = vld [vmem:[%s3767_s21 + $0xd8] sm:$0xff] }
 0x32a   : > { %v1115_v33 = vadd.f32 %v1114_v31, %v982_v27  ;;  %v1227_v34 = vpop.f32.mrb[42].mxu1  ;;  %3278 = vmatprep.subr.bf16.mxu1 %v3277_v23  ;;  %v1116_v35 = vpop.f32.mrb[43].mxu0  ;;  %3264 = vmatpush1.bf16.msra.mxu0 %v3263_v12  ;;  %v1263_v47 = vmax.f32 %v1224_v32, 0.0  ;;  %v3041_v31 = vld [vmem:[%s3767_s21 + $0xe0] sm:$0xff]  ;;  %v3042_v32 = vld [vmem:[%s3767_s21 + $0xe8] sm:$0xff] }
 0x32b   : > { %v1228_v36 = vadd.f32 %v1227_v34, %v982_v27  ;;  %v1117_v37 = vadd.f32 %v1116_v35, %v982_v27  ;;  %v1229_v38 = vpop.f32.mrb[43].mxu1  ;;  %3280 = vmatpush1.bf16.msra.mxu1 %v3279_v19  ;;  %v3044_v34 = vld [vmem:[%s3767_s21 + $0xf8] sm:$0xff] }
 0x32c   : > { %v1264_v40 = vmax.f32 %v1115_v33, 0.0  ;;  %v1230_v41 = vadd.f32 %v1229_v38, %v982_v27  ;;  %v3038_v27 = vld [vmem:[%s3767_s21 + $0xc8] sm:$0xff]  ;;  %v3043_v33 = vld [vmem:[%s3767_s21 + $0xf0] sm:$0xff]  ;;  %v1297_v38 = vpop.permute.xlu0 %1296 }
 0x32d   : > { %v1266_v44 = vmax.f32 %v1228_v36, 0.0  ;;  %v1265_v45 = vmax.f32 %v1117_v37, 0.0  ;;  %v1120_v46 = vpop.f32.mrb[44].mxu0 }
 0x32e   : > { %v3267_v48 = vpack.c.bf16 %v1264_v40, %v1260_v39  ;;  %v1267_v49 = vmax.f32 %v1230_v41, 0.0  ;;  %v1233_v50 = vpop.f32.mrb[44].mxu1  ;;  %v1122_v51 = vpop.f32.mrb[45].mxu0  ;;  %v1121_v57 = vadd.f32 %v1120_v46, %v987_v52 }
 0x32f   : > { %v3283_v53 = vpack.c.bf16 %v1266_v44, %v1262_v42  ;;  %v3265_v54 = vpack.c.bf16 %v1265_v45, %v1261_v43  ;;  %v1235_v55 = vpop.f32.mrb[45].mxu1  ;;  %v1234_v59 = vadd.f32 %v1233_v50, %v987_v52  ;;  %v1123_v60 = vadd.f32 %v1122_v51, %v987_v52  ;;  %v1302_v41 = vpop.permute.xlu1 %1301 }
 0x330   : > { %v3281_v56 = vpack.c.bf16 %v1267_v49, %v1263_v47  ;;  %v1236_v62 = vadd.f32 %v1235_v55, %v987_v52  ;;  %v1268_v6 = vmax.f32 %v1121_v57, 0.0 }
 0x331   : > { %v1126_v61 = vpop.f32.mrb[46].mxu0  ;;  %3266 = vmatprep.subr.bf16.mxu0 %v3265_v54  ;;  %v1270_v11 = vmax.f32 %v1234_v59, 0.0  ;;  %v1269_v12 = vmax.f32 %v1123_v60, 0.0 }
 0x332   : > { %v1127_v63 = vadd.f32 %v1126_v61, %v992_v58  ;;  %v1239_v0 = vpop.f32.mrb[46].mxu1  ;;  %3282 = vmatprep.subr.bf16.mxu1 %v3281_v56  ;;  %v1128_v2 = vpop.f32.mrb[47].mxu0  ;;  %3268 = vmatpush1.bf16.msra.mxu0 %v3267_v48  ;;  %v1271_v16 = vmax.f32 %v1236_v62, 0.0 }
 0x333   : > { %v1240_v3 = vadd.f32 %v1239_v0, %v992_v58  ;;  %v1129_v4 = vadd.f32 %v1128_v2, %v992_v58  ;;  %v1241_v5 = vpop.f32.mrb[47].mxu1  ;;  %3284 = vmatpush1.bf16.msra.mxu1 %v3283_v53  ;;  %v1307_v2 = vpop.permute.xlu0 %1306 }
 0x334   : > { %v1272_v7 = vmax.f32 %v1127_v63, 0.0  ;;  %v1242_v10 = vadd.f32 %v1241_v5, %v992_v58 }
 0x335   : > { %v1274_v14 = vmax.f32 %v1240_v3, 0.0  ;;  %v1273_v15 = vmax.f32 %v1129_v4, 0.0 }
 0x336   : > { %v3271_v18 = vpack.c.bf16 %v1272_v7, %v1268_v6  ;;  %v1275_v19 = vmax.f32 %v1242_v10, 0.0  ;;  %v1312_v10 = vpop.permute.xlu1 %1311 }
 0x337   : > { %v3287_v20 = vpack.c.bf16 %v1274_v14, %v1270_v11  ;;  %v3269_v22 = vpack.c.bf16 %v1273_v15, %v1269_v12 }
 0x338   : > { %v3285_v23 = vpack.c.bf16 %v1275_v19, %v1271_v16 }
 0x339   : > { %3270 = vmatprep.subr.bf16.mxu0 %v3269_v22 }
 0x33a   : > { %3286 = vmatprep.subr.bf16.mxu1 %v3285_v23  ;;  %3272 = vmatpush1.bf16.msra.mxu0 %v3271_v18 }
 0x33b   : > { %3288 = vmatpush1.bf16.msra.mxu1 %v3287_v20 }
 0x33d   : > { %3053 = vmatmul.mubr.msk.f32.vlgmr.msra.gmra.mrb[48].mxu0 %vm653_vm1, %v3037_v24 }
 0x33e   : > { %3061 = vmatmul.mubr.msk.f32.vlgmr.msra.gmra.mrb[48].mxu1 %vm653_vm1, %v3037_v24  ;;  %1428 = vmatprep.mubr.f32.mxu0 %v3628_v1 }
 0x33f   : > { %1541 = vmatprep.mubr.f32.mxu1 %v3628_v1 }
 0x341   : > { %3054 = vmatmul.mubr.msk.f32.gmra.mrb[50].mxu0 %vm653_vm1, %v3038_v27 }
 0x342   : > { %3062 = vmatmul.mubr.msk.f32.gmra.mrb[50].mxu1 %vm653_vm1, %v3038_v27  ;;  %1434 = vmatprep.mubr.f32.mxu0 %v3628_v1 }
 0x343   : > { %1547 = vmatprep.mubr.f32.mxu1 %v3628_v1 }
 0x345   : > { %3055 = vmatmul.mubr.msk.f32.gmra.mrb[52].mxu0 %vm653_vm1, %v3039_v28 }
 0x346   : > { %3063 = vmatmul.mubr.msk.f32.gmra.mrb[52].mxu1 %vm653_vm1, %v3039_v28  ;;  %1440 = vmatprep.mubr.f32.mxu0 %v3628_v1 }
 0x347   : > { %1553 = vmatprep.mubr.f32.mxu1 %v3628_v1 }
 0x349   : > { %3056 = vmatmul.mubr.msk.f32.gmra.mrb[54].mxu0 %vm653_vm1, %v3040_v29 }
 0x34a   : > { %3064 = vmatmul.mubr.msk.f32.gmra.mrb[54].mxu1 %vm653_vm1, %v3040_v29  ;;  %1446 = vmatprep.mubr.f32.mxu0 %v3628_v1 }
 0x34b   : > { %1559 = vmatprep.mubr.f32.mxu1 %v3628_v1 }
 0x34d   : > { %3057 = vmatmul.mubr.msk.f32.gmra.mrb[56].mxu0 %vm653_vm1, %v3041_v31 }
 0x34e   : > { %3065 = vmatmul.mubr.msk.f32.gmra.mrb[56].mxu1 %vm653_vm1, %v3041_v31  ;;  %1452 = vmatprep.mubr.f32.mxu0 %v3628_v1 }
 0x34f   : > { %1565 = vmatprep.mubr.f32.mxu1 %v3628_v1 }
 0x351   : > { %3058 = vmatmul.mubr.msk.f32.gmra.mrb[58].mxu0 %vm653_vm1, %v3042_v32 }
 0x352   : > { %3066 = vmatmul.mubr.msk.f32.gmra.mrb[58].mxu1 %vm653_vm1, %v3042_v32  ;;  %1458 = vmatprep.mubr.f32.mxu0 %v3628_v1 }
 0x353   : > { %1571 = vmatprep.mubr.f32.mxu1 %v3628_v1 }
 0x355   : > { %3059 = vmatmul.mubr.msk.f32.gmra.mrb[60].mxu0 %vm653_vm1, %v3043_v33 }
 0x356   : > { %3067 = vmatmul.mubr.msk.f32.gmra.mrb[60].mxu1 %vm653_vm1, %v3043_v33  ;;  %1464 = vmatprep.mubr.f32.mxu0 %v3628_v1 }
 0x357   : > { %1577 = vmatprep.mubr.f32.mxu1 %v3628_v1 }
 0x359   : > { %3060 = vmatmul.mubr.msk.f32.gmra.mrb[62].mxu0 %vm653_vm1, %v3044_v34 }
 0x35a   : > { %3068 = vmatmul.mubr.msk.f32.gmra.mrb[62].mxu1 %vm653_vm1, %v3044_v34  ;;  %1763 = vmatprep.mubr.f32.mxu0 %v3628_v1 }
 0x35b   : > { %1876 = vmatprep.mubr.f32.mxu1 %v3628_v1 }
 0x410   : > { %v1424_v35 = vpop.f32.mrb[48].mxu0 }
 0x411   : > { %v1537_v36 = vpop.f32.mrb[48].mxu1  ;;  %v1426_v37 = vpop.f32.mrb[49].mxu0  ;;  %v1425_v40 = vadd.f32 %v1424_v35, %v1297_v38 }
 0x412   : > { %v1539_v39 = vpop.f32.mrb[49].mxu1  ;;  %v1538_v42 = vadd.f32 %v1537_v36, %v1297_v38  ;;  %v1427_v43 = vadd.f32 %v1426_v37, %v1297_v38 }
 0x413   : > { %v1540_v45 = vadd.f32 %v1539_v39, %v1297_v38  ;;  %v1584_v52 = vmax.f32 %v1425_v40, 0.0  ;;  %v1317_v40 = vpop.permute.xlu0 %1316 }
 0x414   : > { %v1430_v44 = vpop.f32.mrb[50].mxu0  ;;  %v1586_v55 = vmax.f32 %v1538_v42, 0.0  ;;  %v1585_v56 = vmax.f32 %v1427_v43, 0.0 }
 0x415   : > { %v1431_v46 = vadd.f32 %v1430_v44, %v1302_v41  ;;  %v1543_v47 = vpop.f32.mrb[50].mxu1  ;;  %v1432_v48 = vpop.f32.mrb[51].mxu0  ;;  %v1587_v60 = vmax.f32 %v1540_v45, 0.0 }
 0x416   : > { %v1544_v49 = vadd.f32 %v1543_v47, %v1302_v41  ;;  %v1433_v50 = vadd.f32 %v1432_v48, %v1302_v41  ;;  %v1545_v51 = vpop.f32.mrb[51].mxu1 }
 0x417   : > { %v1588_v53 = vmax.f32 %v1431_v46, 0.0  ;;  %v1546_v54 = vadd.f32 %v1545_v51, %v1302_v41  ;;  %v1322_v46 = vpop.permute.xlu1 %1321 }
 0x418   : > { %v1590_v57 = vmax.f32 %v1544_v49, 0.0  ;;  %v1589_v58 = vmax.f32 %v1433_v50, 0.0  ;;  %v1436_v59 = vpop.f32.mrb[52].mxu0 }
 0x419   : > { %v3291_v61 = vpack.c.bf16 %v1588_v53, %v1584_v52  ;;  %v1591_v62 = vmax.f32 %v1546_v54, 0.0  ;;  %v1549_v63 = vpop.f32.mrb[52].mxu1  ;;  %v1438_v0 = vpop.f32.mrb[53].mxu0  ;;  %v1437_v7 = vadd.f32 %v1436_v59, %v1307_v2 }
 0x41a   : > { %v3315_v3 = vpack.c.bf16 %v1590_v57, %v1586_v55  ;;  %v3289_v4 = vpack.c.bf16 %v1589_v58, %v1585_v56  ;;  %v1551_v5 = vpop.f32.mrb[53].mxu1  ;;  %v1550_v11 = vadd.f32 %v1549_v63, %v1307_v2  ;;  %v1439_v12 = vadd.f32 %v1438_v0, %v1307_v2 }
 0x41b   : > { %v3313_v6 = vpack.c.bf16 %v1591_v62, %v1587_v60  ;;  %v1552_v15 = vadd.f32 %v1551_v5, %v1307_v2  ;;  %v1592_v24 = vmax.f32 %v1437_v7, 0.0  ;;  %v1327_v7 = vpop.permute.xlu0 %1326 }
 0x41c   : > { %v1442_v14 = vpop.f32.mrb[54].mxu0  ;;  %3290 = vmatprep.subr.bf16.mxu0 %v3289_v4  ;;  %v1594_v29 = vmax.f32 %v1550_v11, 0.0  ;;  %v1593_v31 = vmax.f32 %v1439_v12, 0.0 }
 0x41d   : > { %v1443_v16 = vadd.f32 %v1442_v14, %v1312_v10  ;;  %v1555_v18 = vpop.f32.mrb[54].mxu1  ;;  %3314 = vmatprep.subr.bf16.mxu1 %v3313_v6  ;;  %v1444_v19 = vpop.f32.mrb[55].mxu0  ;;  %3292 = vmatpush1.bf16.msra.mxu0 %v3291_v61  ;;  %v1595_v35 = vmax.f32 %v1552_v15, 0.0 }
 0x41e   : > { %v1556_v20 = vadd.f32 %v1555_v18, %v1312_v10  ;;  %v1445_v22 = vadd.f32 %v1444_v19, %v1312_v10  ;;  %v1557_v23 = vpop.f32.mrb[55].mxu1  ;;  %3316 = vmatpush1.bf16.msra.mxu1 %v3315_v3 }
 0x41f   : > { %v1596_v27 = vmax.f32 %v1443_v16, 0.0  ;;  %v1558_v28 = vadd.f32 %v1557_v23, %v1312_v10  ;;  %v1332_v16 = vpop.permute.xlu1 %1331 }
 0x420   : > { %v1598_v32 = vmax.f32 %v1556_v20, 0.0  ;;  %v1597_v33 = vmax.f32 %v1445_v22, 0.0  ;;  %v1448_v34 = vpop.f32.mrb[56].mxu0 }
 0x421   : > { %v3295_v36 = vpack.c.bf16 %v1596_v27, %v1592_v24  ;;  %v1599_v37 = vmax.f32 %v1558_v28, 0.0  ;;  %v1561_v38 = vpop.f32.mrb[56].mxu1  ;;  %v1450_v39 = vpop.f32.mrb[57].mxu0  ;;  %v1449_v45 = vadd.f32 %v1448_v34, %v1317_v40 }
 0x422   : > { %v3319_v41 = vpack.c.bf16 %v1598_v32, %v1594_v29  ;;  %v3293_v42 = vpack.c.bf16 %v1597_v33, %v1593_v31  ;;  %v1563_v43 = vpop.f32.mrb[57].mxu1  ;;  %v1562_v47 = vadd.f32 %v1561_v38, %v1317_v40  ;;  %v1451_v48 = vadd.f32 %v1450_v39, %v1317_v40 }
 0x423   : > { %v3317_v44 = vpack.c.bf16 %v1599_v37, %v1595_v35  ;;  %v1564_v50 = vadd.f32 %v1563_v43, %v1317_v40  ;;  %v1600_v57 = vmax.f32 %v1449_v45, 0.0  ;;  %v3069_v45 = vld [vmem:[%s3767_s21 + $0x100] sm:$0xff] }
 0x424   : > { %v1454_v49 = vpop.f32.mrb[58].mxu0  ;;  %3294 = vmatprep.subr.bf16.mxu0 %v3293_v42  ;;  %v1602_v60 = vmax.f32 %v1562_v47, 0.0  ;;  %v1601_v61 = vmax.f32 %v1451_v48, 0.0  ;;  %v1637_v48 = vpop.permute.xlu0 %1636 }
 0x425   : > { %v1455_v51 = vadd.f32 %v1454_v49, %v1322_v46  ;;  %v1567_v52 = vpop.f32.mrb[58].mxu1  ;;  %3318 = vmatprep.subr.bf16.mxu1 %v3317_v44  ;;  %v1456_v53 = vpop.f32.mrb[59].mxu0  ;;  %3296 = vmatpush1.bf16.msra.mxu0 %v3295_v36  ;;  %v1603_v2 = vmax.f32 %v1564_v50, 0.0 }
 0x426   : > { %v1568_v54 = vadd.f32 %v1567_v52, %v1322_v46  ;;  %v1457_v55 = vadd.f32 %v1456_v53, %v1322_v46  ;;  %v1569_v56 = vpop.f32.mrb[59].mxu1  ;;  %3320 = vmatpush1.bf16.msra.mxu1 %v3319_v41 }
 0x427   : > { %v1604_v58 = vmax.f32 %v1455_v51, 0.0  ;;  %v1570_v59 = vadd.f32 %v1569_v56, %v1322_v46  ;;  %v1642_v51 = vpop.permute.xlu1 %1641 }
 0x428   : > { %v1606_v62 = vmax.f32 %v1568_v54, 0.0  ;;  %v1605_v63 = vmax.f32 %v1457_v55, 0.0  ;;  %v1460_v0 = vpop.f32.mrb[60].mxu0 }
 0x429   : > { %v3299_v3 = vpack.c.bf16 %v1604_v58, %v1600_v57  ;;  %v1607_v4 = vmax.f32 %v1570_v59, 0.0  ;;  %v1573_v5 = vpop.f32.mrb[60].mxu1  ;;  %v1462_v6 = vpop.f32.mrb[61].mxu0  ;;  %v1461_v15 = vadd.f32 %v1460_v0, %v1327_v7 }
 0x42a   : > { %v3323_v10 = vpack.c.bf16 %v1606_v62, %v1602_v60  ;;  %v3297_v11 = vpack.c.bf16 %v1605_v63, %v1601_v61  ;;  %v1575_v12 = vpop.f32.mrb[61].mxu1  ;;  %v1574_v18 = vadd.f32 %v1573_v5, %v1327_v7  ;;  %v1463_v19 = vadd.f32 %v1462_v6, %v1327_v7 }
 0x42b   : > { %v3321_v14 = vpack.c.bf16 %v1607_v4, %v1603_v2  ;;  %v1576_v22 = vadd.f32 %v1575_v12, %v1327_v7  ;;  %v1608_v32 = vmax.f32 %v1461_v15, 0.0  ;;  %v1647_v15 = vpop.permute.xlu0 %1646 }
 0x42c   : > { %v1466_v20 = vpop.f32.mrb[62].mxu0  ;;  %3298 = vmatprep.subr.bf16.mxu0 %v3297_v11  ;;  %v1610_v35 = vmax.f32 %v1574_v18, 0.0  ;;  %v1609_v36 = vmax.f32 %v1463_v19, 0.0 }
 0x42d   : > { %v1467_v23 = vadd.f32 %v1466_v20, %v1332_v16  ;;  %v1579_v24 = vpop.f32.mrb[62].mxu1  ;;  %3322 = vmatprep.subr.bf16.mxu1 %v3321_v14  ;;  %v1468_v27 = vpop.f32.mrb[63].mxu0  ;;  %3300 = vmatpush1.bf16.msra.mxu0 %v3299_v3  ;;  %v1611_v39 = vmax.f32 %v1576_v22, 0.0 }
 0x42e   : > { %v1580_v28 = vadd.f32 %v1579_v24, %v1332_v16  ;;  %v1469_v29 = vadd.f32 %v1468_v27, %v1332_v16  ;;  %v1581_v31 = vpop.f32.mrb[63].mxu1  ;;  %3324 = vmatpush1.bf16.msra.mxu1 %v3323_v10 }
 0x42f   : > { %v1612_v33 = vmax.f32 %v1467_v23, 0.0  ;;  %v1582_v34 = vadd.f32 %v1581_v31, %v1332_v16  ;;  %v1652_v23 = vpop.permute.xlu1 %1651 }
 0x430   : > { %v1614_v37 = vmax.f32 %v1580_v28, 0.0  ;;  %v1613_v38 = vmax.f32 %v1469_v29, 0.0 }
 0x431   : > { %v3303_v40 = vpack.c.bf16 %v1612_v33, %v1608_v32  ;;  %v1615_v41 = vmax.f32 %v1582_v34, 0.0 }
 0x432   : > { %v3327_v42 = vpack.c.bf16 %v1614_v37, %v1610_v35  ;;  %v3301_v43 = vpack.c.bf16 %v1613_v38, %v1609_v36 }
 0x433   : > { %v3325_v44 = vpack.c.bf16 %v1615_v41, %v1611_v39 }
 0x434   : > { %3302 = vmatprep.subr.bf16.mxu0 %v3301_v43 }
 0x435   : > { %3326 = vmatprep.subr.bf16.mxu1 %v3325_v44  ;;  %3304 = vmatpush1.bf16.msra.mxu0 %v3303_v40 }
 0x436   : > { %3328 = vmatpush1.bf16.msra.mxu1 %v3327_v42  ;;  %3306 = vmatprep.subr.bf16.mxu0 %v3792_v8  ;;  %v3070_v8 = vld [vmem:[%s3767_s21 + $0x108] sm:$0xff] }
 0x437   : > { %3330 = vmatprep.subr.bf16.mxu1 %v3794_v9  ;;  %v3071_v9 = vld [vmem:[%s3767_s21 + $0x110] sm:$0xff] }
 0x439   : > { %3308 = vmatpush1.bf16.msra.mxu0 %v3799_v13  ;;  %v3072_v13 = vld [vmem:[%s3767_s21 + $0x118] sm:$0xff] }
 0x43a   : > { %3332 = vmatpush1.bf16.msra.mxu1 %v3810_v17  ;;  %3310 = vmatprep.subr.bf16.mxu0 %v3816_v21  ;;  %v3073_v17 = vld [vmem:[%s3767_s21 + $0x120] sm:$0xff]  ;;  %v3074_v21 = vld [vmem:[%s3767_s21 + $0x128] sm:$0xff] }
 0x43b   : > { %3334 = vmatprep.subr.bf16.mxu1 %v3822_v25  ;;  %v3075_v25 = vld [vmem:[%s3767_s21 + $0x130] sm:$0xff] }
 0x43d   : > { %3312 = vmatpush1.bf16.msra.mxu0 %v3824_v26  ;;  %v3076_v26 = vld [vmem:[%s3767_s21 + $0x138] sm:$0xff] }
 0x43e   : > { %3336 = vmatpush1.bf16.msra.mxu1 %v3832_v30 }
 0x440   : > { %3085 = vmatmul.mubr.msk.f32.vlgmr.msra.gmra.mrb[64].mxu0 %vm1674_vm2, %v3069_v45 }
 0x441   : > { %3093 = vmatmul.mubr.msk.f32.vlgmr.msra.gmra.mrb[64].mxu1 %vm1674_vm2, %v3069_v45  ;;  %1769 = vmatprep.mubr.f32.mxu0 %v3628_v1 }
 0x442   : > { %1882 = vmatprep.mubr.f32.mxu1 %v3628_v1 }
 0x444   : > { %3086 = vmatmul.mubr.msk.f32.gmra.mrb[66].mxu0 %vm1674_vm2, %v3070_v8 }
 0x445   : > { %3094 = vmatmul.mubr.msk.f32.gmra.mrb[66].mxu1 %vm1674_vm2, %v3070_v8  ;;  %1775 = vmatprep.mubr.f32.mxu0 %v3628_v1 }
 0x446   : > { %1888 = vmatprep.mubr.f32.mxu1 %v3628_v1 }
 0x448   : > { %3087 = vmatmul.mubr.msk.f32.gmra.mrb[68].mxu0 %vm1674_vm2, %v3071_v9 }
 0x449   : > { %3095 = vmatmul.mubr.msk.f32.gmra.mrb[68].mxu1 %vm1674_vm2, %v3071_v9  ;;  %1781 = vmatprep.mubr.f32.mxu0 %v3628_v1 }
 0x44a   : > { %1894 = vmatprep.mubr.f32.mxu1 %v3628_v1 }
 0x44c   : > { %3088 = vmatmul.mubr.msk.f32.gmra.mrb[70].mxu0 %vm1674_vm2, %v3072_v13 }
 0x44d   : > { %3096 = vmatmul.mubr.msk.f32.gmra.mrb[70].mxu1 %vm1674_vm2, %v3072_v13  ;;  %1787 = vmatprep.mubr.f32.mxu0 %v3628_v1 }
 0x44e   : > { %1900 = vmatprep.mubr.f32.mxu1 %v3628_v1 }
 0x450   : > { %3089 = vmatmul.mubr.msk.f32.gmra.mrb[72].mxu0 %vm1674_vm2, %v3073_v17 }
 0x451   : > { %3097 = vmatmul.mubr.msk.f32.gmra.mrb[72].mxu1 %vm1674_vm2, %v3073_v17  ;;  %1793 = vmatprep.mubr.f32.mxu0 %v3628_v1 }
 0x452   : > { %1906 = vmatprep.mubr.f32.mxu1 %v3628_v1 }
 0x454   : > { %3090 = vmatmul.mubr.msk.f32.gmra.mrb[74].mxu0 %vm1674_vm2, %v3074_v21 }
 0x455   : > { %3098 = vmatmul.mubr.msk.f32.gmra.mrb[74].mxu1 %vm1674_vm2, %v3074_v21  ;;  %1799 = vmatprep.mubr.f32.mxu0 %v3628_v1  ;;  %v1657_v21 = vpop.permute.xlu0 %1656 }
 0x456   : > { %1912 = vmatprep.mubr.f32.mxu1 %v3628_v1 }
 0x458   : > { %3091 = vmatmul.mubr.msk.f32.gmra.mrb[76].mxu0 %vm1674_vm2, %v3075_v25 }
 0x459   : > { %3099 = vmatmul.mubr.msk.f32.gmra.mrb[76].mxu1 %vm1674_vm2, %v3075_v25  ;;  %1805 = vmatprep.mubr.f32.mxu0 %v3628_v1 }
 0x45a   : > { %1918 = vmatprep.mubr.f32.mxu1 %v3628_v1 }
 0x45c   : > { %3092 = vmatmul.mubr.msk.f32.gmra.mrb[78].mxu0 %vm1674_vm2, %v3076_v26 }
 0x45d   : > { %3100 = vmatmul.mubr.msk.f32.gmra.mrb[78].mxu1 %vm1674_vm2, %v3076_v26  ;;  %2103 = vmatprep.mubr.f32.mxu0 %v3628_v1 }
 0x45e   : > { %2216 = vmatprep.mubr.f32.mxu1 %v3628_v1 }
 0x513   : > { %v1765_v30 = vpop.f32.mrb[64].mxu0 }
 0x514   : > { %v1878_v46 = vpop.f32.mrb[64].mxu1  ;;  %v1767_v47 = vpop.f32.mrb[65].mxu0  ;;  %v1766_v50 = vadd.f32 %v1765_v30, %v1637_v48 }
 0x515   : > { %v1880_v49 = vpop.f32.mrb[65].mxu1  ;;  %v1879_v52 = vadd.f32 %v1878_v46, %v1637_v48  ;;  %v1768_v53 = vadd.f32 %v1767_v47, %v1637_v48 }
 0x516   : > { %v1881_v55 = vadd.f32 %v1880_v49, %v1637_v48  ;;  %v1925_v62 = vmax.f32 %v1766_v50, 0.0  ;;  %v1662_v48 = vpop.permute.xlu1 %1661 }
 0x517   : > { %v1771_v54 = vpop.f32.mrb[66].mxu0  ;;  %v1927_v2 = vmax.f32 %v1879_v52, 0.0  ;;  %v1926_v3 = vmax.f32 %v1768_v53, 0.0 }
 0x518   : > { %v1772_v56 = vadd.f32 %v1771_v54, %v1642_v51  ;;  %v1884_v57 = vpop.f32.mrb[66].mxu1  ;;  %v1773_v58 = vpop.f32.mrb[67].mxu0  ;;  %v1928_v7 = vmax.f32 %v1881_v55, 0.0 }
 0x519   : > { %v1885_v59 = vadd.f32 %v1884_v57, %v1642_v51  ;;  %v1774_v60 = vadd.f32 %v1773_v58, %v1642_v51  ;;  %v1886_v61 = vpop.f32.mrb[67].mxu1 }
 0x51a   : > { %v1929_v63 = vmax.f32 %v1772_v56, 0.0  ;;  %v1887_v0 = vadd.f32 %v1886_v61, %v1642_v51 }
 0x51b   : > { %v1931_v4 = vmax.f32 %v1885_v59, 0.0  ;;  %v1930_v5 = vmax.f32 %v1774_v60, 0.0  ;;  %v1777_v6 = vpop.f32.mrb[68].mxu0 }
 0x51c   : > { %v3339_v10 = vpack.c.bf16 %v1929_v63, %v1925_v62  ;;  %v1932_v11 = vmax.f32 %v1887_v0, 0.0  ;;  %v1890_v12 = vpop.f32.mrb[68].mxu1  ;;  %v1779_v14 = vpop.f32.mrb[69].mxu0  ;;  %v1778_v22 = vadd.f32 %v1777_v6, %v1647_v15 }
 0x51d   : > { %v3355_v16 = vpack.c.bf16 %v1931_v4, %v1927_v2  ;;  %v3337_v18 = vpack.c.bf16 %v1930_v5, %v1926_v3  ;;  %v1892_v19 = vpop.f32.mrb[69].mxu1  ;;  %v1891_v24 = vadd.f32 %v1890_v12, %v1647_v15  ;;  %v1780_v27 = vadd.f32 %v1779_v14, %v1647_v15 }
 0x51e   : > { %v3353_v20 = vpack.c.bf16 %v1932_v11, %v1928_v7  ;;  %v1893_v29 = vadd.f32 %v1892_v19, %v1647_v15  ;;  %v1933_v37 = vmax.f32 %v1778_v22, 0.0  ;;  %v1667_v11 = vpop.permute.xlu0 %1666  ;;  %v1672_v19 = vpop.permute.xlu1 %1671 }
 0x51f   : > { %v1783_v28 = vpop.f32.mrb[70].mxu0  ;;  %3338 = vmatprep.subr.bf16.mxu0 %v3337_v18  ;;  %v1935_v40 = vmax.f32 %v1891_v24, 0.0  ;;  %v1934_v41 = vmax.f32 %v1780_v27, 0.0 }
 0x520   : > { %v1784_v31 = vadd.f32 %v1783_v28, %v1652_v23  ;;  %v1896_v32 = vpop.f32.mrb[70].mxu1  ;;  %3354 = vmatprep.subr.bf16.mxu1 %v3353_v20  ;;  %v1785_v33 = vpop.f32.mrb[71].mxu0  ;;  %3340 = vmatpush1.bf16.msra.mxu0 %v3339_v10  ;;  %v1936_v45 = vmax.f32 %v1893_v29, 0.0 }
 0x521   : > { %v1897_v34 = vadd.f32 %v1896_v32, %v1652_v23  ;;  %v1786_v35 = vadd.f32 %v1785_v33, %v1652_v23  ;;  %v1898_v36 = vpop.f32.mrb[71].mxu1  ;;  %3356 = vmatpush1.bf16.msra.mxu1 %v3355_v16 }
 0x522   : > { %v1937_v38 = vmax.f32 %v1784_v31, 0.0  ;;  %v1899_v39 = vadd.f32 %v1898_v36, %v1652_v23 }
 0x523   : > { %v1939_v42 = vmax.f32 %v1897_v34, 0.0  ;;  %v1938_v43 = vmax.f32 %v1786_v35, 0.0  ;;  %v1789_v44 = vpop.f32.mrb[72].mxu0 }
 0x524   : > { %v3343_v8 = vpack.c.bf16 %v1937_v38, %v1933_v37  ;;  %v1940_v9 = vmax.f32 %v1899_v39, 0.0  ;;  %v1902_v13 = vpop.f32.mrb[72].mxu1  ;;  %v1791_v17 = vpop.f32.mrb[73].mxu0  ;;  %v1790_v47 = vadd.f32 %v1789_v44, %v1657_v21 }
 0x525   : > { %v3359_v25 = vpack.c.bf16 %v1939_v42, %v1935_v40  ;;  %v3341_v26 = vpack.c.bf16 %v1938_v43, %v1934_v41  ;;  %v1904_v30 = vpop.f32.mrb[73].mxu1  ;;  %v1903_v49 = vadd.f32 %v1902_v13, %v1657_v21  ;;  %v1792_v50 = vadd.f32 %v1791_v17, %v1657_v21  ;;  %v3102_v13 = vld [vmem:[%s3767_s21 + $0x148] sm:$0xff]  ;;  %v3103_v17 = vld [vmem:[%s3767_s21 + $0x150] sm:$0xff] }
 0x526   : > { %v3357_v46 = vpack.c.bf16 %v1940_v9, %v1936_v45  ;;  %v1905_v52 = vadd.f32 %v1904_v30, %v1657_v21  ;;  %v1941_v59 = vmax.f32 %v1790_v47, 0.0  ;;  %v3101_v9 = vld [vmem:[%s3767_s21 + $0x140] sm:$0xff]  ;;  %v3104_v21 = vld [vmem:[%s3767_s21 + $0x158] sm:$0xff]  ;;  %v3107_v30 = vld [vmem:[%s3767_s21 + $0x170] sm:$0xff] }
 0x527   : > { %v1795_v51 = vpop.f32.mrb[74].mxu0  ;;  %3342 = vmatprep.subr.bf16.mxu0 %v3341_v26  ;;  %v1943_v62 = vmax.f32 %v1903_v49, 0.0  ;;  %v1942_v63 = vmax.f32 %v1792_v50, 0.0  ;;  %v3106_v26 = vld [vmem:[%s3767_s21 + $0x168] sm:$0xff]  ;;  %v1978_v50 = vpop.permute.xlu0 %1977 }
 0x528   : > { %v1796_v53 = vadd.f32 %v1795_v51, %v1662_v48  ;;  %v1908_v54 = vpop.f32.mrb[74].mxu1  ;;  %3358 = vmatprep.subr.bf16.mxu1 %v3357_v46  ;;  %v1797_v55 = vpop.f32.mrb[75].mxu0  ;;  %3344 = vmatpush1.bf16.msra.mxu0 %v3343_v8  ;;  %v1944_v4 = vmax.f32 %v1905_v52, 0.0  ;;  %v3108_v46 = vld [vmem:[%s3767_s21 + $0x178] sm:$0xff] }
 0x529   : > { %v1909_v56 = vadd.f32 %v1908_v54, %v1662_v48  ;;  %v1798_v57 = vadd.f32 %v1797_v55, %v1662_v48  ;;  %v1910_v58 = vpop.f32.mrb[75].mxu1  ;;  %3360 = vmatpush1.bf16.msra.mxu1 %v3359_v25  ;;  %v3105_v25 = vld [vmem:[%s3767_s21 + $0x160] sm:$0xff] }
 0x52a   : > { %v1945_v60 = vmax.f32 %v1796_v53, 0.0  ;;  %v1911_v61 = vadd.f32 %v1910_v58, %v1662_v48  ;;  %v1983_v53 = vpop.permute.xlu1 %1982 }
 0x52b   : > { %v1947_v0 = vmax.f32 %v1909_v56, 0.0  ;;  %v1946_v2 = vmax.f32 %v1798_v57, 0.0  ;;  %v1801_v3 = vpop.f32.mrb[76].mxu0 }
 0x52c   : > { %v3347_v5 = vpack.c.bf16 %v1945_v60, %v1941_v59  ;;  %v1948_v6 = vmax.f32 %v1911_v61, 0.0  ;;  %v1914_v7 = vpop.f32.mrb[76].mxu1  ;;  %v1803_v10 = vpop.f32.mrb[77].mxu0  ;;  %v1802_v18 = vadd.f32 %v1801_v3, %v1667_v11 }
 0x52d   : > { %v3363_v12 = vpack.c.bf16 %v1947_v0, %v1943_v62  ;;  %v3345_v14 = vpack.c.bf16 %v1946_v2, %v1942_v63  ;;  %v1916_v15 = vpop.f32.mrb[77].mxu1  ;;  %v1915_v20 = vadd.f32 %v1914_v7, %v1667_v11  ;;  %v1804_v22 = vadd.f32 %v1803_v10, %v1667_v11 }
 0x52e   : > { %v3361_v16 = vpack.c.bf16 %v1948_v6, %v1944_v4  ;;  %v1917_v24 = vadd.f32 %v1916_v15, %v1667_v11  ;;  %v1949_v34 = vmax.f32 %v1802_v18, 0.0  ;;  %v1988_v18 = vpop.permute.xlu0 %1987 }
 0x52f   : > { %v1807_v23 = vpop.f32.mrb[78].mxu0  ;;  %3346 = vmatprep.subr.bf16.mxu0 %v3345_v14  ;;  %v1951_v37 = vmax.f32 %v1915_v20, 0.0  ;;  %v1950_v38 = vmax.f32 %v1804_v22, 0.0 }
 0x530   : > { %v1808_v27 = vadd.f32 %v1807_v23, %v1672_v19  ;;  %v1920_v28 = vpop.f32.mrb[78].mxu1  ;;  %3362 = vmatprep.subr.bf16.mxu1 %v3361_v16  ;;  %v1809_v29 = vpop.f32.mrb[79].mxu0  ;;  %3348 = vmatpush1.bf16.msra.mxu0 %v3347_v5  ;;  %v1952_v41 = vmax.f32 %v1917_v24, 0.0 }
 0x531   : > { %v1921_v31 = vadd.f32 %v1920_v28, %v1672_v19  ;;  %v1810_v32 = vadd.f32 %v1809_v29, %v1672_v19  ;;  %v1922_v33 = vpop.f32.mrb[79].mxu1  ;;  %3364 = vmatpush1.bf16.msra.mxu1 %v3363_v12 }
 0x532   : > { %v1953_v35 = vmax.f32 %v1808_v27, 0.0  ;;  %v1923_v36 = vadd.f32 %v1922_v33, %v1672_v19  ;;  %v1993_v27 = vpop.permute.xlu1 %1992 }
 0x533   : > { %v1955_v39 = vmax.f32 %v1921_v31, 0.0  ;;  %v1954_v40 = vmax.f32 %v1810_v32, 0.0 }
 0x534   : > { %v3351_v42 = vpack.c.bf16 %v1953_v35, %v1949_v34  ;;  %v1956_v43 = vmax.f32 %v1923_v36, 0.0 }
 0x535   : > { %v3367_v44 = vpack.c.bf16 %v1955_v39, %v1951_v37  ;;  %v3349_v45 = vpack.c.bf16 %v1954_v40, %v1950_v38 }
 0x536   : > { %v3365_v8 = vpack.c.bf16 %v1956_v43, %v1952_v41 }
 0x537   : > { %3350 = vmatprep.subr.bf16.mxu0 %v3349_v45 }
 0x538   : > { %3366 = vmatprep.subr.bf16.mxu1 %v3365_v8  ;;  %3352 = vmatpush1.bf16.msra.mxu0 %v3351_v42 }
 0x539   : > { %3368 = vmatpush1.bf16.msra.mxu1 %v3367_v44 }
 0x53b   : > { %3117 = vmatmul.mubr.msk.f32.vlgmr.msra.gmra.mrb[80].mxu0 %vm653_vm1, %v3101_v9 }
 0x53c   : > { %3125 = vmatmul.mubr.msk.f32.vlgmr.msra.gmra.mrb[80].mxu1 %vm653_vm1, %v3101_v9  ;;  %2109 = vmatprep.mubr.f32.mxu0 %v3628_v1 }
 0x53d   : > { %2222 = vmatprep.mubr.f32.mxu1 %v3628_v1 }
 0x53f   : > { %3118 = vmatmul.mubr.msk.f32.gmra.mrb[82].mxu0 %vm653_vm1, %v3102_v13 }
 0x540   : > { %3126 = vmatmul.mubr.msk.f32.gmra.mrb[82].mxu1 %vm653_vm1, %v3102_v13  ;;  %2115 = vmatprep.mubr.f32.mxu0 %v3628_v1 }
 0x541   : > { %2228 = vmatprep.mubr.f32.mxu1 %v3628_v1 }
 0x543   : > { %3119 = vmatmul.mubr.msk.f32.gmra.mrb[84].mxu0 %vm653_vm1, %v3103_v17 }
 0x544   : > { %3127 = vmatmul.mubr.msk.f32.gmra.mrb[84].mxu1 %vm653_vm1, %v3103_v17  ;;  %2121 = vmatprep.mubr.f32.mxu0 %v3628_v1 }
 0x545   : > { %2234 = vmatprep.mubr.f32.mxu1 %v3628_v1 }
 0x547   : > { %3120 = vmatmul.mubr.msk.f32.gmra.mrb[86].mxu0 %vm653_vm1, %v3104_v21 }
 0x548   : > { %3128 = vmatmul.mubr.msk.f32.gmra.mrb[86].mxu1 %vm653_vm1, %v3104_v21  ;;  %2127 = vmatprep.mubr.f32.mxu0 %v3628_v1 }
 0x549   : > { %2240 = vmatprep.mubr.f32.mxu1 %v3628_v1 }
 0x54b   : > { %3121 = vmatmul.mubr.msk.f32.gmra.mrb[88].mxu0 %vm653_vm1, %v3105_v25 }
 0x54c   : > { %3129 = vmatmul.mubr.msk.f32.gmra.mrb[88].mxu1 %vm653_vm1, %v3105_v25  ;;  %2133 = vmatprep.mubr.f32.mxu0 %v3628_v1 }
 0x54d   : > { %2246 = vmatprep.mubr.f32.mxu1 %v3628_v1 }
 0x54f   : > { %3122 = vmatmul.mubr.msk.f32.gmra.mrb[90].mxu0 %vm653_vm1, %v3106_v26 }
 0x550   : > { %3130 = vmatmul.mubr.msk.f32.gmra.mrb[90].mxu1 %vm653_vm1, %v3106_v26  ;;  %2139 = vmatprep.mubr.f32.mxu0 %v3628_v1  ;;  %v1998_v26 = vpop.permute.xlu0 %1997 }
 0x551   : > { %2252 = vmatprep.mubr.f32.mxu1 %v3628_v1 }
 0x553   : > { %3123 = vmatmul.mubr.msk.f32.gmra.mrb[92].mxu0 %vm653_vm1, %v3107_v30 }
 0x554   : > { %3131 = vmatmul.mubr.msk.f32.gmra.mrb[92].mxu1 %vm653_vm1, %v3107_v30  ;;  %2145 = vmatprep.mubr.f32.mxu0 %v3628_v1 }
 0x555   : > { %2258 = vmatprep.mubr.f32.mxu1 %v3628_v1 }
 0x557   : > { %3124 = vmatmul.mubr.msk.f32.gmra.mrb[94].mxu0 %vm653_vm1, %v3108_v46 }
 0x558   : > { %3132 = vmatmul.mubr.msk.f32.gmra.mrb[94].mxu1 %vm653_vm1, %v3108_v46  ;;  %2443 = vmatprep.mubr.f32.mxu0 %v3628_v1 }
 0x559   : > { %2556 = vmatprep.mubr.f32.mxu1 %v3628_v1 }
 0x60e   : > { %v2105_v47 = vpop.f32.mrb[80].mxu0 }
 0x60f   : > { %v2218_v48 = vpop.f32.mrb[80].mxu1  ;;  %v2107_v49 = vpop.f32.mrb[81].mxu0  ;;  %v2106_v52 = vadd.f32 %v2105_v47, %v1978_v50 }
 0x610   : > { %v2220_v51 = vpop.f32.mrb[81].mxu1  ;;  %v2219_v54 = vadd.f32 %v2218_v48, %v1978_v50  ;;  %v2108_v55 = vadd.f32 %v2107_v49, %v1978_v50 }
 0x611   : > { %v2221_v57 = vadd.f32 %v2220_v51, %v1978_v50  ;;  %v2265_v0 = vmax.f32 %v2106_v52, 0.0  ;;  %v2003_v50 = vpop.permute.xlu1 %2002 }
 0x612   : > { %v2111_v56 = vpop.f32.mrb[82].mxu0  ;;  %v2267_v4 = vmax.f32 %v2219_v54, 0.0  ;;  %v2266_v5 = vmax.f32 %v2108_v55, 0.0 }
 0x613   : > { %v2112_v58 = vadd.f32 %v2111_v56, %v1983_v53  ;;  %v2224_v59 = vpop.f32.mrb[82].mxu1  ;;  %v2113_v60 = vpop.f32.mrb[83].mxu0  ;;  %v2268_v11 = vmax.f32 %v2221_v57, 0.0 }
 0x614   : > { %v2225_v61 = vadd.f32 %v2224_v59, %v1983_v53  ;;  %v2114_v62 = vadd.f32 %v2113_v60, %v1983_v53  ;;  %v2226_v63 = vpop.f32.mrb[83].mxu1 }
 0x615   : > { %v2269_v2 = vmax.f32 %v2112_v58, 0.0  ;;  %v2227_v3 = vadd.f32 %v2226_v63, %v1983_v53 }
 0x616   : > { %v2271_v6 = vmax.f32 %v2225_v61, 0.0  ;;  %v2270_v7 = vmax.f32 %v2114_v62, 0.0  ;;  %v2117_v10 = vpop.f32.mrb[84].mxu0 }
 0x617   : > { %v3371_v12 = vpack.c.bf16 %v2269_v2, %v2265_v0  ;;  %v2272_v14 = vmax.f32 %v2227_v3, 0.0  ;;  %v2230_v15 = vpop.f32.mrb[84].mxu1  ;;  %v2119_v16 = vpop.f32.mrb[85].mxu0  ;;  %v2118_v24 = vadd.f32 %v2117_v10, %v1988_v18 }
 0x618   : > { %v3387_v19 = vpack.c.bf16 %v2271_v6, %v2267_v4  ;;  %v3369_v20 = vpack.c.bf16 %v2270_v7, %v2266_v5  ;;  %v2232_v22 = vpop.f32.mrb[85].mxu1  ;;  %v2231_v28 = vadd.f32 %v2230_v15, %v1988_v18  ;;  %v2120_v29 = vadd.f32 %v2119_v16, %v1988_v18 }
 0x619   : > { %v3385_v23 = vpack.c.bf16 %v2272_v14, %v2268_v11  ;;  %v2233_v32 = vadd.f32 %v2232_v22, %v1988_v18  ;;  %v2273_v39 = vmax.f32 %v2118_v24, 0.0  ;;  %v2008_v14 = vpop.permute.xlu0 %2007  ;;  %v2013_v22 = vpop.permute.xlu1 %2012 }
 0x61a   : > { %v2123_v31 = vpop.f32.mrb[86].mxu0  ;;  %3370 = vmatprep.subr.bf16.mxu0 %v3369_v20  ;;  %v2275_v42 = vmax.f32 %v2231_v28, 0.0  ;;  %v2274_v43 = vmax.f32 %v2120_v29, 0.0 }
 0x61b   : > { %v2124_v33 = vadd.f32 %v2123_v31, %v1993_v27  ;;  %v2236_v34 = vpop.f32.mrb[86].mxu1  ;;  %3386 = vmatprep.subr.bf16.mxu1 %v3385_v23  ;;  %v2125_v35 = vpop.f32.mrb[87].mxu0  ;;  %3372 = vmatpush1.bf16.msra.mxu0 %v3371_v12  ;;  %v2276_v9 = vmax.f32 %v2233_v32, 0.0 }
 0x61c   : > { %v2237_v36 = vadd.f32 %v2236_v34, %v1993_v27  ;;  %v2126_v37 = vadd.f32 %v2125_v35, %v1993_v27  ;;  %v2238_v38 = vpop.f32.mrb[87].mxu1  ;;  %3388 = vmatpush1.bf16.msra.mxu1 %v3387_v19 }
 0x61d   : > { %v2277_v40 = vmax.f32 %v2124_v33, 0.0  ;;  %v2239_v41 = vadd.f32 %v2238_v38, %v1993_v27 }
 0x61e   : > { %v2279_v44 = vmax.f32 %v2237_v36, 0.0  ;;  %v2278_v45 = vmax.f32 %v2126_v37, 0.0  ;;  %v2129_v8 = vpop.f32.mrb[88].mxu0 }
 0x61f   : > { %v3375_v13 = vpack.c.bf16 %v2277_v40, %v2273_v39  ;;  %v2280_v17 = vmax.f32 %v2239_v41, 0.0  ;;  %v2242_v21 = vpop.f32.mrb[88].mxu1  ;;  %v2131_v25 = vpop.f32.mrb[89].mxu0  ;;  %v2130_v49 = vadd.f32 %v2129_v8, %v1998_v26 }
 0x620   : > { %v3391_v30 = vpack.c.bf16 %v2279_v44, %v2275_v42  ;;  %v3373_v46 = vpack.c.bf16 %v2278_v45, %v2274_v43  ;;  %v2244_v47 = vpop.f32.mrb[89].mxu1  ;;  %v2243_v51 = vadd.f32 %v2242_v21, %v1998_v26  ;;  %v2132_v52 = vadd.f32 %v2131_v25, %v1998_v26  ;;  %v3134_v21 = vld [vmem:[%s3767_s21 + $0x188] sm:$0xff]  ;;  %v3135_v25 = vld [vmem:[%s3767_s21 + $0x190] sm:$0xff] }
 0x621   : > { %v3389_v48 = vpack.c.bf16 %v2280_v17, %v2276_v9  ;;  %v2245_v54 = vadd.f32 %v2244_v47, %v1998_v26  ;;  %v2281_v61 = vmax.f32 %v2130_v49, 0.0  ;;  %v3133_v17 = vld [vmem:[%s3767_s21 + $0x180] sm:$0xff]  ;;  %v3136_v26 = vld [vmem:[%s3767_s21 + $0x198] sm:$0xff]  ;;  %v3139_v47 = vld [vmem:[%s3767_s21 + $0x1b0] sm:$0xff] }
 0x622   : > { %v2135_v53 = vpop.f32.mrb[90].mxu0  ;;  %3374 = vmatprep.subr.bf16.mxu0 %v3373_v46  ;;  %v2283_v0 = vmax.f32 %v2243_v51, 0.0  ;;  %v2282_v2 = vmax.f32 %v2132_v52, 0.0  ;;  %v3138_v46 = vld [vmem:[%s3767_s21 + $0x1a8] sm:$0xff]  ;;  %v2318_v52 = vpop.permute.xlu0 %2317 }
 0x623   : > { %v2136_v55 = vadd.f32 %v2135_v53, %v2003_v50  ;;  %v2248_v56 = vpop.f32.mrb[90].mxu1  ;;  %3390 = vmatprep.subr.bf16.mxu1 %v3389_v48  ;;  %v2137_v57 = vpop.f32.mrb[91].mxu0  ;;  %3376 = vmatpush1.bf16.msra.mxu0 %v3375_v13  ;;  %v2284_v6 = vmax.f32 %v2245_v54, 0.0  ;;  %v3140_v48 = vld [vmem:[%s3767_s21 + $0x1b8] sm:$0xff] }
 0x624   : > { %v2249_v58 = vadd.f32 %v2248_v56, %v2003_v50  ;;  %v2138_v59 = vadd.f32 %v2137_v57, %v2003_v50  ;;  %v2250_v60 = vpop.f32.mrb[91].mxu1  ;;  %3392 = vmatpush1.bf16.msra.mxu1 %v3391_v30  ;;  %v3137_v30 = vld [vmem:[%s3767_s21 + $0x1a0] sm:$0xff] }
 0x625   : > { %v2285_v62 = vmax.f32 %v2136_v55, 0.0  ;;  %v2251_v63 = vadd.f32 %v2250_v60, %v2003_v50  ;;  %v2323_v55 = vpop.permute.xlu1 %2322 }
 0x626   : > { %v2287_v3 = vmax.f32 %v2249_v58, 0.0  ;;  %v2286_v4 = vmax.f32 %v2138_v59, 0.0  ;;  %v2141_v5 = vpop.f32.mrb[92].mxu0 }
 0x627   : > { %v3379_v7 = vpack.c.bf16 %v2285_v62, %v2281_v61  ;;  %v2288_v10 = vmax.f32 %v2251_v63, 0.0  ;;  %v2254_v11 = vpop.f32.mrb[92].mxu1  ;;  %v2143_v12 = vpop.f32.mrb[93].mxu0  ;;  %v2142_v20 = vadd.f32 %v2141_v5, %v2008_v14 }
 0x628   : > { %v3395_v15 = vpack.c.bf16 %v2287_v3, %v2283_v0  ;;  %v3377_v16 = vpack.c.bf16 %v2286_v4, %v2282_v2  ;;  %v2256_v18 = vpop.f32.mrb[93].mxu1  ;;  %v2255_v23 = vadd.f32 %v2254_v11, %v2008_v14  ;;  %v2144_v24 = vadd.f32 %v2143_v12, %v2008_v14 }
 0x629   : > { %v3393_v19 = vpack.c.bf16 %v2288_v10, %v2284_v6  ;;  %v2257_v28 = vadd.f32 %v2256_v18, %v2008_v14  ;;  %v2289_v36 = vmax.f32 %v2142_v20, 0.0 }
 0x62a   : > { %v2147_v27 = vpop.f32.mrb[94].mxu0  ;;  %3378 = vmatprep.subr.bf16.mxu0 %v3377_v16  ;;  %v2291_v39 = vmax.f32 %v2255_v23, 0.0  ;;  %v2290_v40 = vmax.f32 %v2144_v24, 0.0 }
 0x62b   : > { %v2148_v29 = vadd.f32 %v2147_v27, %v2013_v22  ;;  %v2260_v31 = vpop.f32.mrb[94].mxu1  ;;  %3394 = vmatprep.subr.bf16.mxu1 %v3393_v19  ;;  %v2149_v32 = vpop.f32.mrb[95].mxu0  ;;  %3380 = vmatpush1.bf16.msra.mxu0 %v3379_v7  ;;  %v2292_v43 = vmax.f32 %v2257_v28, 0.0 }
 0x62c   : > { %v2261_v33 = vadd.f32 %v2260_v31, %v2013_v22  ;;  %v2150_v34 = vadd.f32 %v2149_v32, %v2013_v22  ;;  %v2262_v35 = vpop.f32.mrb[95].mxu1  ;;  %3396 = vmatpush1.bf16.msra.mxu1 %v3395_v15  ;;  %v2328_v19 = vpop.permute.xlu0 %2327 }
 0x62d   : > { %v2293_v37 = vmax.f32 %v2148_v29, 0.0  ;;  %v2263_v38 = vadd.f32 %v2262_v35, %v2013_v22  ;;  %v2333_v28 = vpop.permute.xlu1 %2332 }
 0x62e   : > { %v2295_v41 = vmax.f32 %v2261_v33, 0.0  ;;  %v2294_v42 = vmax.f32 %v2150_v34, 0.0 }
 0x62f   : > { %v3383_v44 = vpack.c.bf16 %v2293_v37, %v2289_v36  ;;  %v2296_v45 = vmax.f32 %v2263_v38, 0.0 }
 0x630   : > { %v3399_v8 = vpack.c.bf16 %v2295_v41, %v2291_v39  ;;  %v3381_v9 = vpack.c.bf16 %v2294_v42, %v2290_v40 }
 0x631   : > { %v3397_v13 = vpack.c.bf16 %v2296_v45, %v2292_v43 }
 0x632   : > { %3382 = vmatprep.subr.bf16.mxu0 %v3381_v9 }
 0x633   : > { %3398 = vmatprep.subr.bf16.mxu1 %v3397_v13  ;;  %3384 = vmatpush1.bf16.msra.mxu0 %v3383_v44 }
 0x634   : > { %3400 = vmatpush1.bf16.msra.mxu1 %v3399_v8 }
 0x636   : > { %3149 = vmatmul.mubr.msk.f32.vlgmr.msra.gmra.mrb[96].mxu0 %vm653_vm1, %v3133_v17 }
 0x637   : > { %3157 = vmatmul.mubr.msk.f32.vlgmr.msra.gmra.mrb[96].mxu1 %vm653_vm1, %v3133_v17  ;;  %2449 = vmatprep.mubr.f32.mxu0 %v3628_v1 }
 0x638   : > { %2562 = vmatprep.mubr.f32.mxu1 %v3628_v1 }
 0x63a   : > { %3150 = vmatmul.mubr.msk.f32.gmra.mrb[98].mxu0 %vm653_vm1, %v3134_v21 }
 0x63b   : > { %3158 = vmatmul.mubr.msk.f32.gmra.mrb[98].mxu1 %vm653_vm1, %v3134_v21  ;;  %2455 = vmatprep.mubr.f32.mxu0 %v3628_v1 }
 0x63c   : > { %2568 = vmatprep.mubr.f32.mxu1 %v3628_v1 }
 0x63e   : > { %3151 = vmatmul.mubr.msk.f32.gmra.mrb[100].mxu0 %vm653_vm1, %v3135_v25 }
 0x63f   : > { %3159 = vmatmul.mubr.msk.f32.gmra.mrb[100].mxu1 %vm653_vm1, %v3135_v25  ;;  %2461 = vmatprep.mubr.f32.mxu0 %v3628_v1 }
 0x640   : > { %2574 = vmatprep.mubr.f32.mxu1 %v3628_v1 }
 0x642   : > { %3152 = vmatmul.mubr.msk.f32.gmra.mrb[102].mxu0 %vm653_vm1, %v3136_v26 }
 0x643   : > { %3160 = vmatmul.mubr.msk.f32.gmra.mrb[102].mxu1 %vm653_vm1, %v3136_v26  ;;  %2467 = vmatprep.mubr.f32.mxu0 %v3628_v1 }
 0x644   : > { %2580 = vmatprep.mubr.f32.mxu1 %v3628_v1 }
 0x646   : > { %3153 = vmatmul.mubr.msk.f32.gmra.mrb[104].mxu0 %vm653_vm1, %v3137_v30 }
 0x647   : > { %3161 = vmatmul.mubr.msk.f32.gmra.mrb[104].mxu1 %vm653_vm1, %v3137_v30  ;;  %2473 = vmatprep.mubr.f32.mxu0 %v3628_v1  ;;  %v2338_v30 = vpop.permute.xlu0 %2337 }
 0x648   : > { %2586 = vmatprep.mubr.f32.mxu1 %v3628_v1 }
 0x64a   : > { %3154 = vmatmul.mubr.msk.f32.gmra.mrb[106].mxu0 %vm653_vm1, %v3138_v46 }
 0x64b   : > { %3162 = vmatmul.mubr.msk.f32.gmra.mrb[106].mxu1 %vm653_vm1, %v3138_v46  ;;  %2479 = vmatprep.mubr.f32.mxu0 %v3628_v1 }
 0x64c   : > { %2592 = vmatprep.mubr.f32.mxu1 %v3628_v1 }
 0x64e   : > { %3155 = vmatmul.mubr.msk.f32.gmra.mrb[108].mxu0 %vm653_vm1, %v3139_v47 }
 0x64f   : > { %3163 = vmatmul.mubr.msk.f32.gmra.mrb[108].mxu1 %vm653_vm1, %v3139_v47  ;;  %2485 = vmatprep.mubr.f32.mxu0 %v3628_v1 }
 0x650   : > { %2598 = vmatprep.mubr.f32.mxu1 %v3628_v1 }
 0x652   : > { %3156 = vmatmul.mubr.msk.f32.gmra.mrb[110].mxu0 %vm653_vm1, %v3140_v48 }
 0x653   : > { %3164 = vmatmul.mubr.msk.f32.gmra.mrb[110].mxu1 %vm653_vm1, %v3140_v48  ;;  %2713 = vmatprep.mubr.f32.mxu0 %v3628_v1 }
 0x654   : > { %2784 = vmatprep.mubr.f32.mxu1 %v3628_v1 }
 0x709   : > { %v2445_v49 = vpop.f32.mrb[96].mxu0 }
 0x70a   : > { %v2558_v50 = vpop.f32.mrb[96].mxu1  ;;  %v2447_v51 = vpop.f32.mrb[97].mxu0  ;;  %v2446_v54 = vadd.f32 %v2445_v49, %v2318_v52 }
 0x70b   : > { %v2560_v53 = vpop.f32.mrb[97].mxu1  ;;  %v2559_v56 = vadd.f32 %v2558_v50, %v2318_v52  ;;  %v2448_v57 = vadd.f32 %v2447_v51, %v2318_v52  ;;  %v2343_v51 = vpop.permute.xlu1 %2342 }
 0x70c   : > { %v2561_v59 = vadd.f32 %v2560_v53, %v2318_v52  ;;  %v2605_v3 = vmax.f32 %v2446_v54, 0.0 }
 0x70d   : > { %v2451_v58 = vpop.f32.mrb[98].mxu0  ;;  %v2607_v5 = vmax.f32 %v2559_v56, 0.0  ;;  %v2606_v6 = vmax.f32 %v2448_v57, 0.0 }
 0x70e   : > { %v2452_v60 = vadd.f32 %v2451_v58, %v2323_v55  ;;  %v2564_v61 = vpop.f32.mrb[98].mxu1  ;;  %v2453_v62 = vpop.f32.mrb[99].mxu0  ;;  %v2608_v12 = vmax.f32 %v2561_v59, 0.0 }
 0x70f   : > { %v2565_v63 = vadd.f32 %v2564_v61, %v2323_v55  ;;  %v2454_v0 = vadd.f32 %v2453_v62, %v2323_v55  ;;  %v2566_v2 = vpop.f32.mrb[99].mxu1 }
 0x710   : > { %v2609_v4 = vmax.f32 %v2452_v60, 0.0  ;;  %v2567_v1 = vadd.f32 %v2566_v2, %v2323_v55 }
 0x711   : > { %v2611_v7 = vmax.f32 %v2565_v63, 0.0  ;;  %v2610_v10 = vmax.f32 %v2454_v0, 0.0  ;;  %v2457_v11 = vpop.f32.mrb[100].mxu0 }
 0x712   : > { %v3403_v14 = vpack.c.bf16 %v2609_v4, %v2605_v3  ;;  %v2612_v15 = vmax.f32 %v2567_v1, 0.0  ;;  %v2570_v16 = vpop.f32.mrb[100].mxu1  ;;  %v2459_v18 = vpop.f32.mrb[101].mxu0  ;;  %v2458_v27 = vadd.f32 %v2457_v11, %v2328_v19 }
 0x713   : > { %v3419_v20 = vpack.c.bf16 %v2611_v7, %v2607_v5  ;;  %v3401_v22 = vpack.c.bf16 %v2610_v10, %v2606_v6  ;;  %v2572_v23 = vpop.f32.mrb[101].mxu1  ;;  %v2571_v29 = vadd.f32 %v2570_v16, %v2328_v19  ;;  %v2460_v31 = vadd.f32 %v2459_v18, %v2328_v19 }
 0x714   : > { %v3417_v24 = vpack.c.bf16 %v2612_v15, %v2608_v12  ;;  %v2573_v33 = vadd.f32 %v2572_v23, %v2328_v19  ;;  %v2613_v40 = vmax.f32 %v2458_v27, 0.0 }
 0x715   : > { %v2463_v32 = vpop.f32.mrb[102].mxu0  ;;  %3402 = vmatprep.subr.bf16.mxu0 %v3401_v22  ;;  %v2615_v43 = vmax.f32 %v2571_v29, 0.0  ;;  %v2614_v44 = vmax.f32 %v2460_v31, 0.0  ;;  %v2353_v22 = vpop.permute.xlu1 %2352 }
 0x716   : > { %v2464_v34 = vadd.f32 %v2463_v32, %v2333_v28  ;;  %v2576_v35 = vpop.f32.mrb[102].mxu1  ;;  %3418 = vmatprep.subr.bf16.mxu1 %v3417_v24  ;;  %v2465_v36 = vpop.f32.mrb[103].mxu0  ;;  %3404 = vmatpush1.bf16.msra.mxu0 %v3403_v14  ;;  %v2616_v13 = vmax.f32 %v2573_v33, 0.0 }
 0x717   : > { %v2577_v37 = vadd.f32 %v2576_v35, %v2333_v28  ;;  %v2466_v38 = vadd.f32 %v2465_v36, %v2333_v28  ;;  %v2578_v39 = vpop.f32.mrb[103].mxu1  ;;  %3420 = vmatpush1.bf16.msra.mxu1 %v3419_v20  ;;  %v2348_v14 = vpop.permute.xlu0 %2347 }
 0x718   : > { %v2617_v41 = vmax.f32 %v2464_v34, 0.0  ;;  %v2579_v42 = vadd.f32 %v2578_v39, %v2333_v28 }
 0x719   : > { %v2619_v45 = vmax.f32 %v2577_v37, 0.0  ;;  %v2618_v8 = vmax.f32 %v2466_v38, 0.0  ;;  %v2469_v9 = vpop.f32.mrb[104].mxu0 }
 0x71a   : > { %v3407_v17 = vpack.c.bf16 %v2617_v41, %v2613_v40  ;;  %v2620_v21 = vmax.f32 %v2579_v42, 0.0  ;;  %v2582_v25 = vpop.f32.mrb[104].mxu1  ;;  %v2471_v26 = vpop.f32.mrb[105].mxu0  ;;  %v2470_v50 = vadd.f32 %v2469_v9, %v2338_v30 }
 0x71b   : > { %v3423_v46 = vpack.c.bf16 %v2619_v45, %v2615_v43  ;;  %v3405_v47 = vpack.c.bf16 %v2618_v8, %v2614_v44  ;;  %v2584_v48 = vpop.f32.mrb[105].mxu1  ;;  %v2583_v52 = vadd.f32 %v2582_v25, %v2338_v30  ;;  %v2472_v53 = vadd.f32 %v2471_v26, %v2338_v30 }
 0x71c   : > { %v3421_v49 = vpack.c.bf16 %v2620_v21, %v2616_v13  ;;  %v2585_v55 = vadd.f32 %v2584_v48, %v2338_v30  ;;  %v2621_v62 = vmax.f32 %v2470_v50, 0.0  ;;  %v2644_v21 = vpop.permute.xlu0 %2643 }
 0x71d   : > { %v2475_v54 = vpop.f32.mrb[106].mxu0  ;;  %3406 = vmatprep.subr.bf16.mxu0 %v3405_v47  ;;  %v2623_v2 = vmax.f32 %v2583_v52, 0.0  ;;  %v2622_v3 = vmax.f32 %v2472_v53, 0.0  ;;  %v2804_v53 = vlaneseq }
 0x71e   : > { %v2476_v56 = vadd.f32 %v2475_v54, %v2343_v51  ;;  %v2588_v57 = vpop.f32.mrb[106].mxu1  ;;  %3422 = vmatprep.subr.bf16.mxu1 %v3421_v49  ;;  %v2477_v58 = vpop.f32.mrb[107].mxu0  ;;  %3408 = vmatpush1.bf16.msra.mxu0 %v3407_v17  ;;  %v2624_v6 = vmax.f32 %v2585_v55, 0.0  ;;  %v3165_v17 = vld [vmem:[%s3767_s21 + $0x1c0] sm:$0x1]  ;;  %s2954_s21 = sshll.u32 %s3763_s11, 2 }
 0x71f   : > { %v2589_v59 = vadd.f32 %v2588_v57, %v2343_v51  ;;  %v2478_v60 = vadd.f32 %v2477_v58, %v2343_v51  ;;  %v2590_v61 = vpop.f32.mrb[107].mxu1  ;;  %3424 = vmatpush1.bf16.msra.mxu1 %v3423_v46  ;;  %v2805_v55 = vshrl.u32 %v2804_v53, 7  ;;  %s228_s6 = scalar_lea.vmem [#allocation5], %s2954_s21  ;;  %vm2826_vm3 = vcmp.lt.s32.totalorder %v2804_v53, 512 }
 0x720   : > { %v2625_v63 = vmax.f32 %v2476_v56, 0.0  ;;  %v2591_v0 = vadd.f32 %v2590_v61, %v2343_v51  ;;  %v3629_v51 = vmov 1966171168   ;;  %s2846_s8 = sshll.u32 %s228_s6, 4  ;;  %s4291_s8 = int_to_ptr.vmem [resolvable:$true] %s2846_s8 }
 0x721   : > { %v2627_v4 = vmax.f32 %v2589_v59, 0.0  ;;  %v2626_v1 = vmax.f32 %v2478_v60, 0.0  ;;  %v2481_v5 = vpop.f32.mrb[108].mxu0  ;;  %v2802_v52 = vunpack.c.l.s4 %v3629_v51  ;;  %s3540_s23 = scalar_lea.vmem %s4291_s8, 64  ;;  %p3547_p13 = scmp.lt.s32.totalorder %s4291_s8, %s3545_s28 }
 0x722   : > { %v3411_v7 = vpack.c.bf16 %v2625_v63, %v2621_v62  ;;  %v2628_v10 = vmax.f32 %v2591_v0, 0.0  ;;  %v2594_v11 = vpop.f32.mrb[108].mxu1  ;;  %v2483_v12 = vpop.f32.mrb[109].mxu0  ;;  %v2482_v20 = vadd.f32 %v2481_v5, %v2348_v14  ;;  %p3541_p8 = scmp.ne.s32.totalorder %s4291_s8, %s3540_s23  ;;  %p3548_p2 = scmp.lt.s32.totalorder %s3546_s29, %s3540_s23 }
 0x723   : > { %v3427_v15 = vpack.c.bf16 %v2627_v4, %v2623_v2  ;;  %v3409_v16 = vpack.c.bf16 %v2626_v1, %v2622_v3  ;;  %v2596_v18 = vpop.f32.mrb[109].mxu1  ;;  %v2595_v23 = vadd.f32 %v2594_v11, %v2348_v14  ;;  %v2484_v24 = vadd.f32 %v2483_v12, %v2348_v14 }
 0x724   : > { %v3425_v19 = vpack.c.bf16 %v2628_v10, %v2624_v6  ;;  %v2597_v28 = vadd.f32 %v2596_v18, %v2348_v14  ;;  %v2629_v36 = vmax.f32 %v2482_v20, 0.0  ;;  %v2803_v54 = vunpack.c.0.s8 %v2802_v52  ;;  %p3542_p0 = pnand %p3541_p8, %p4349_p11  ;;  %p3549_p5 = por %p3548_p2, %p3547_p13 }
 0x725   : > { %v2487_v27 = vpop.f32.mrb[110].mxu0  ;;  %3410 = vmatprep.subr.bf16.mxu0 %v3409_v16  ;;  %v2631_v39 = vmax.f32 %v2595_v23, 0.0  ;;  %v2630_v40 = vmax.f32 %v2484_v24, 0.0 }
 0x726   : > { %v2488_v29 = vadd.f32 %v2487_v27, %v2353_v22  ;;  %v2600_v31 = vpop.f32.mrb[110].mxu1  ;;  %3426 = vmatprep.subr.bf16.mxu1 %v3425_v19  ;;  %v2489_v32 = vpop.f32.mrb[111].mxu0  ;;  %3412 = vmatpush1.bf16.msra.mxu0 %v3411_v7  ;;  %v2632_v43 = vmax.f32 %v2597_v28, 0.0  ;;  %v2806_v58 = vsub.s32 %v2803_v54, %v2805_v55  ;;  %p3543_p6 = pneg %p3542_p0 }
 0x727   : > { %v2601_v33 = vadd.f32 %v2600_v31, %v2353_v22  ;;  %v2490_v34 = vadd.f32 %v2489_v32, %v2353_v22  ;;  %v2602_v35 = vpop.f32.mrb[111].mxu1  ;;  %3428 = vmatpush1.bf16.msra.mxu1 %v3427_v15 }
 0x728   : > { %v2633_v37 = vmax.f32 %v2488_v29, 0.0  ;;  %v2603_v38 = vadd.f32 %v2602_v35, %v2353_v22  ;;  %p3550_p4 = pnand %p3549_p5, %p3543_p6 }
 0x729   : > { %v2635_v41 = vmax.f32 %v2601_v33, 0.0  ;;  %v2634_v42 = vmax.f32 %v2490_v34, 0.0 }
 0x72a   : > { %v3415_v44 = vpack.c.bf16 %v2633_v37, %v2629_v36  ;;  %v2636_v45 = vmax.f32 %v2603_v38, 0.0 }
 0x72b   : > { %v3431_v8 = vpack.c.bf16 %v2635_v41, %v2631_v39  ;;  %v3413_v9 = vpack.c.bf16 %v2634_v42, %v2630_v40 }
 0x72c   : > { %v3429_v13 = vpack.c.bf16 %v2636_v45, %v2632_v43 }
 0x72d   : > { %3414 = vmatprep.subr.bf16.mxu0 %v3413_v9 }
 0x72e   : > { %3430 = vmatprep.subr.bf16.mxu1 %v3429_v13  ;;  %3416 = vmatpush1.bf16.msra.mxu0 %v3415_v44 }
 0x72f   : > { %3432 = vmatpush1.bf16.msra.mxu1 %v3431_v8 }
 0x731   : > { %3167 = vmatmul.mubr.msk.f32.vlgmr.msra.gmra.mrb[112].mxu0 %vm653_vm1, %v3165_v17 }
 0x732   : > { %3168 = vmatmul.mubr.msk.f32.vlgmr.msra.gmra.mrb[112].mxu1 %vm653_vm1, %v3165_v17 }
 0x804   : > { %v2715_v25 = vpop.f32.mrb[112].mxu0 }
 0x805   : > { %v2716_v26 = vadd.f32 %v2715_v25, %v2644_v21  ;;  %v2786_v30 = vpop.f32.mrb[112].mxu1  ;;  %v2717_v46 = vpop.f32.mrb[113].mxu0 }
 0x806   : > { %v2787_v47 = vadd.f32 %v2786_v30, %v2644_v21  ;;  %v2718_v48 = vadd.f32 %v2717_v46, %v2644_v21  ;;  %v2788_v49 = vpop.f32.mrb[113].mxu1 }
 0x807   : > { %3502 = vtanh.f32 %v2716_v26  ;;  %v2789_v50 = vadd.f32 %v2788_v49, %v2644_v21 }
 0x808   : > { %3504 = vtanh.f32 %v2787_v47 }
 0x809   : > { %3506 = vtanh.f32 %v2718_v48 }
 0x80a   : > { %3508 = vtanh.f32 %v2789_v50 }
 0x811   : > { %v3503_v56 = vpop.eup %3502 }
 0x812   : > { %v3505_v57 = vpop.eup %3504 }
 0x813   : > { %v3507_v59 = vpop.eup %3506 }
 0x814   : > { %v3509_v60 = vpop.eup %3508  ;;  %v2799_v61 = vcombine.low %v3503_v56, %v3507_v59 }
 0x815   : > { %v2800_v62 = vcombine.low %v3505_v57, %v3509_v60 }
 0x816   : > { %v2807_v63 = vrot.slane %v2799_v61, %v2806_v58 }
 0x817   : > { %v2814_v0 = vrot.slane %v2800_v62, %v2806_v58 }
 0x819   : > { %v2815_v2 = vcombine.low %v2807_v63, %v2814_v0 }
 0x81b   : > { %v2822_v3 = vrot.slane %v2815_v2, %v2806_v58 }
 0x81d   : > { %2828 = vst.msk [vmem:[%s228_s6] sm:$0xf] %vm2826_vm3, %v2822_v3 }
 0x81e   : > { %3553 = shalt.err (!%p3550_p4)
}
 0x81f   : > { %s3554_s11 = scalar_lea.hbm %s4289_s22, 64  ;;  %s3558_s5 = scalar_lea.hbm %s4341_s3, 128 }
 0x820   : > { %p3555_p7 = scmp.ne.s32.totalorder %s4289_s22, %s3554_s11  ;;  %p3559_p1 = scmp.lt.u32.totalorder %s4289_s22, %s4341_s3 }
 0x821   : > { %p3560_p3 = scmp.lt.u32.totalorder %s3558_s5, %s3554_s11  ;;  %p3562_p8 = scmp.lt.u32.totalorder %s3554_s11, %s4289_s22 }
 0x822   : > { %p3556_p10 = pnand %p3555_p7, %p4349_p11 }
 0x823   : > { %p3561_p9 = por %p3560_p3, %p3559_p1 }
 0x824   : > { %p3557_p12 = pneg %p3556_p10 }
 0x825   : > { %p3563_p0 = por %p3562_p8, %p3561_p9 }
 0x827   : > { %p3564_p6 = pnand %p3563_p0, %p3557_p12 }
 0x829   : > { %3567 = shalt.err (!%p3564_p6)
}
 0x82a   : > { %3435 = dma.vmem_to_hbm [thread:$0]  (%p4349_p11), %s4291_s8, 64, %s4289_s22, %s2830_s24  }
 0x82b PF: > { %s2858_s21 = sand.u32 1, %s3602_s12   ;;  %p4350_p13 = scmp.ne.s32.totalorder %s4346_s27, 0 }
 0x82c   : > { %p4351_p2 = scmp.ge.s32.totalorder %s3622_s17, 2  ;;  %s2859_s19 = scalar_lea.sflag [#allocation4], %s2858_s21 }
 0x82e   : > { %p3442_p5 = pnand %p4351_p2, %p4350_p13 }
 0x830   : > { %3597 = dma.done.wait (!%p3442_p5), %s2859_s19, 64  }
 0x831   : > { %3599 = vsyncadd (!%p3442_p5), %s2859_s19, 4294967232  ;;  %s19_s17 = sadd.s32 1, %s3622_s17   ;;  %s4352_s12 = smov %s3606_s13 }
 0x832   : > { %p16_p4 = scmp.ge.s32.totalorder %s19_s17, 4   ;;  %s4353_s13 = smov %s3610_s14 }
 0x833   : > { %s4354_s14 = smov %s3707_s26  ;;  %s4355_s15 = smov %s3618_s16 }
 0x834   : > { %s4356_s16 = smov %s4358_s20  ;;  %18 = sbr.rel (!%p16_p4) target bundleno = 6 (0x6), region = 94 }
 0x83b   :  { %2864 = vsyncpa [#allocation3], 1 }
 0x83c   :  { %2866 = vsyncpa [#allocation3 + $0x1], 1 }
 0x83d   :  { %2867 = vsyncpa [#allocation4], 1 }
 0x83e   :  { %2869 = vsyncpa [#allocation4 + $0x1], 1 }

</bundles_post_ra>
